<compile_context>
chip_gen: v5e
topology: v5e:2x2
jax: 0.10.0
libtpu: 0.0.40
codegen_flags: <defaults>
</compile_context>

<pallas_src>
import functools

import jax
import jax.numpy as jnp
from jax import lax
from jax.experimental import pallas as pl
from jax.experimental.pallas import tpu as pltpu


_VMEM_LIMIT = 48 * 1024 * 1024   # above the 16-32 MiB scoped defaults, < v7x physical


def _round_up(x, m):
    return (x + m - 1) // m * m


def _choose_tm(m_rows, k, n_cols, tm_max=512, budget=32 * 1024 * 1024):
    """Largest row tile (multiple of 128, <= tm_max) whose double-buffered
    working set fits a conservative VMEM budget (v7x has only 64 MiB)."""
    tm = max(128, min(tm_max, _round_up(m_rows, 128)))
    while tm > 128:
        need = (2 * tm * k * 2           # x blocks, bf16, double buffered
                + 2 * k * n_cols * 2     # resident weight (bf16)
                + 2 * tm * n_cols * 4    # out blocks, <= f32, double buffered
                + 2 * n_cols * 4)        # bias
        if need <= budget:
            break
        tm //= 2
    return tm


# ---------------------------------------------------------------------------
# Kernel 1: row-tiled fused GEMM + bias (+ ReLU) — used for the spatial conv.
# ---------------------------------------------------------------------------
def _gemm_bias_kernel(x_ref, w_ref, b_ref, o_ref, *, relu):
    acc = jnp.dot(x_ref[...], w_ref[...], preferred_element_type=jnp.float32)
    y = acc + b_ref[...]
    if relu:
        y = jnp.maximum(y, 0.0)
    o_ref[...] = y.astype(o_ref.dtype)


def fused_gemm_bias(x2d, w2d, bias, *, relu=True, out_dtype=jnp.bfloat16,
                    tm_max=512):
    """out = [relu](x2d @ w2d + bias), bf16 operands, f32 accumulation."""
    M, K = x2d.shape
    Kw, Nc = w2d.shape
    assert K == Kw
    tm = _choose_tm(M, K, Nc, tm_max)
    grid = (pl.cdiv(M, tm),)          # ragged tail handled by Pallas (no pad/slice)
    bias2 = bias.reshape(1, Nc).astype(jnp.float32)
    return pl.pallas_call(
        functools.partial(_gemm_bias_kernel, relu=relu),
        out_shape=jax.ShapeDtypeStruct((M, Nc), out_dtype),
        grid=grid,
        in_specs=[
            pl.BlockSpec((tm, K), lambda i: (i, 0)),
            # weight & bias are grid-invariant (stay resident in VMEM)
            pl.BlockSpec((K, Nc), lambda i: (0, 0)),
            pl.BlockSpec((1, Nc), lambda i: (0, 0)),
        ],
        out_specs=pl.BlockSpec((tm, Nc), lambda i: (i, 0)),
        compiler_params=pltpu.CompilerParams(
            dimension_semantics=("parallel",),
            vmem_limit_bytes=_VMEM_LIMIT),
    )(x2d.astype(jnp.bfloat16), w2d, bias2)


# ---------------------------------------------------------------------------
# Kernel 2: temporal (3,1,1) conv as an in-kernel tap reduction (no im2col).
# ---------------------------------------------------------------------------
def _temporal_tap_kernel(y_ref, w_ref, b_ref, o_ref, acc_ref, *,
                         t_stride, t_size, relu):
    tap = pl.program_id(2)
    t_in = pl.program_id(1) * t_stride + tap - 1

    @pl.when(tap == 0)
    def _init():
        acc_ref[...] = jnp.zeros_like(acc_ref)

    @pl.when((t_in >= 0) & (t_in < t_size))          # mask padded edge taps
    def _acc():
        acc_ref[...] += jnp.dot(y_ref[...], w_ref[...],
                                preferred_element_type=jnp.float32)

    @pl.when(tap == pl.num_programs(2) - 1)
    def _fin():
        out = acc_ref[...] + b_ref[...]
        if relu:
            out = jnp.maximum(out, 0.0)
        o_ref[...] = out.astype(o_ref.dtype)


def _temporal_tap_res_kernel(y_ref, w_ref, b_ref, r_ref, o_ref, acc_ref, *,
                             t_stride, t_size, relu):
    tap = pl.program_id(2)
    t_in = pl.program_id(1) * t_stride + tap - 1

    @pl.when(tap == 0)
    def _init():
        acc_ref[...] = jnp.zeros_like(acc_ref)

    @pl.when((t_in >= 0) & (t_in < t_size))
    def _acc():
        acc_ref[...] += jnp.dot(y_ref[...], w_ref[...],
                                preferred_element_type=jnp.float32)

    @pl.when(tap == pl.num_programs(2) - 1)
    def _fin():
        out = acc_ref[...] + b_ref[...] + r_ref[...].astype(jnp.float32)
        if relu:
            out = jnp.maximum(out, 0.0)
        o_ref[...] = out.astype(o_ref.dtype)


def temporal_conv_bn(y, w3, bias, *, stride=1, residual=None, relu=True,
                     out_dtype=jnp.float32):
    """(3,1,1) conv, pad (1,0,0), stride (stride,1,1), fused folded-BN bias
    (+ residual) (+ ReLU). The 3 taps are a reduction grid axis."""
    N, T, H, W, Cm = y.shape
    K3, Cm2, Co = w3.shape
    assert K3 == 3 and Cm2 == Cm
    To = (T + 2 - 3) // stride + 1
    HW = H * W
    y4 = y.reshape(N, T, HW, Cm).astype(jnp.bfloat16)
    bias2 = bias.reshape(1, Co).astype(jnp.float32)

    # Edge taps fetch a clamped in-bounds block; their contribution is masked
    # inside the kernel, so no zero-padded copy of y is ever materialized.
    def y_map(n, t, k):
        return (n, jnp.clip(t * stride + k - 1, 0, T - 1), 0, 0)

    in_specs = [
        pl.BlockSpec((None, None, HW, Cm), y_map),
        pl.BlockSpec((None, Cm, Co), lambda n, t, k: (k, 0, 0)),
        pl.BlockSpec((1, Co), lambda n, t, k: (0, 0)),
    ]
    args = [y4, w3, bias2]
    if residual is None:
        kernel = functools.partial(_temporal_tap_kernel, t_stride=stride,
                                   t_size=T, relu=relu)
    else:
        assert residual.shape == (N, To, H, W, Co)
        in_specs.append(
            pl.BlockSpec((None, None, HW, Co), lambda n, t, k: (n, t, 0, 0)))
        args.append(residual.reshape(N, To, HW, Co).astype(jnp.float32))
        kernel = functools.partial(_temporal_tap_res_kernel, t_stride=stride,
                                   t_size=T, relu=relu)

    out = pl.pallas_call(
        kernel,
        out_shape=jax.ShapeDtypeStruct((N, To, HW, Co), out_dtype),
        grid=(N, To, 3),
        in_specs=in_specs,
        out_specs=pl.BlockSpec((None, None, HW, Co),
                               lambda n, t, k: (n, t, 0, 0)),
        scratch_shapes=[pltpu.VMEM((HW, Co), jnp.float32)],
        compiler_params=pltpu.CompilerParams(
            dimension_semantics=("parallel", "parallel", "arbitrary"),
            vmem_limit_bytes=_VMEM_LIMIT),
    )(*args)
    return out.reshape(N, To, H, W, Co)


# ---------------------------------------------------------------------------
# Plain-JAX glue: spatial im2col (bf16) and BN folding.
# ---------------------------------------------------------------------------
def im2col_spatial(x, stride):
    """x: (N,T,H,W,C); conv kernel (1,3,3), pad (0,1,1), stride (1,s,s)."""
    N, T, H, W, C = x.shape
    xp = jnp.pad(x, ((0, 0), (0, 0), (1, 1), (1, 1), (0, 0)))
    Ho = (H + 2 - 3) // stride + 1
    Wo = (W + 2 - 3) // stride + 1
    patches = []
    for kh in range(3):
        for kw in range(3):
            sl = xp[:, :, kh::stride, kw::stride, :][:, :, :Ho, :Wo, :]
            patches.append(sl)
    p = jnp.concatenate(patches, axis=-1)                    # (N,T,Ho,Wo,9C)
    return p.reshape(N * T * Ho * Wo, 9 * C), (N, T, Ho, Wo)


def fold_bn(bn, eps=1e-5):
    gamma, beta, mean, var = bn
    scale = gamma / jnp.sqrt(var + eps)
    return scale, beta - mean * scale


# ---------------------------------------------------------------------------
# BasicBlock forward (Pallas path)
# ---------------------------------------------------------------------------
def _r2plus1d_branch(x_ndhwc, p, stride, residual=None):
    """Conv2Plus1D -> folded BN(out) [-> + residual] -> ReLU."""
    mid = p['w_sp_f'].shape[-1]
    xs, (n, t, ho, wo) = im2col_spatial(x_ndhwc.astype(jnp.bfloat16), stride)
    y = fused_gemm_bias(xs, p['w_sp_f'].reshape(-1, mid), p['b_mid'],
                        relu=True, out_dtype=jnp.bfloat16)
    y = y.reshape(n, t, ho, wo, mid)
    out_dtype = jnp.bfloat16 if residual is None else jnp.float32
    return temporal_conv_bn(y, p['w_t_f'], p['b_out'], stride=stride,
                            residual=residual, relu=True, out_dtype=out_dtype)


def basic_block_forward(x_ncdhw, params, stride=1):
    """x: (N, C, T, H, W) float32 -> (N, planes, T, H, W) float32."""
    # TODO(synk): downsample branch not implemented; residual requires stride==1
    # and inplanes == planes (the downsample=None case of the PyTorch module).
    assert stride == 1, "stride>1 requires the (unimplemented) downsample branch"
    x = jnp.transpose(x_ncdhw, (0, 2, 3, 4, 1))              # -> (N,T,H,W,C)
    out = _r2plus1d_branch(x, params['conv1'], stride)       # bf16 intermediate
    out = _r2plus1d_branch(out, params['conv2'], 1,
                           residual=x.astype(jnp.float32))   # f32 output
    return jnp.transpose(out, (0, 4, 1, 2, 3))               # -> NCDHW


# ---------------------------------------------------------------------------
# Reference (lax.conv_general_dilated) using the same folded bf16 weights and
# the same bf16 cast points, f32 accumulation — for correctness checking.
# ---------------------------------------------------------------------------
def _branch_ref(x_ncdhw, p, s, residual=None):
    xb = x_ncdhw.astype(jnp.bfloat16)
    w_sp = jnp.transpose(p['w_sp_f'], (3, 2, 0, 1))[:, :, None, :, :]
    y = lax.conv_general_dilated(
        xb, w_sp, (1, s, s), [(0, 0), (1, 1), (1, 1)],
        dimension_numbers=('NCDHW', 'OIDHW', 'NCDHW'),
        preferred_element_type=jnp.float32)
    y = jax.nn.relu(y + p['b_mid'].reshape(1, -1, 1, 1, 1))
    w_t = jnp.transpose(p['w_t_f'], (2, 1, 0))[:, :, :, None, None]
    z = lax.conv_general_dilated(
        y.astype(jnp.bfloat16), w_t, (s, 1, 1), [(1, 1), (0, 0), (0, 0)],
        dimension_numbers=('NCDHW', 'OIDHW', 'NCDHW'),
        preferred_element_type=jnp.float32)
    z = z + p['b_out'].reshape(1, -1, 1, 1, 1)
    if residual is not None:
        z = z + residual
    return jax.nn.relu(z)


def basic_block_reference(x, params, stride=1):
    out = _branch_ref(x, params['conv1'], stride)
    return _branch_ref(out, params['conv2'], 1, residual=x)


# ---------------------------------------------------------------------------
# Parameter init (shapes as in BasicBlock.__init__) + BN folding / bf16 prep.
# ---------------------------------------------------------------------------
def init_params(key, inplanes, planes):
    mid = inplanes * planes * 3 * 3 * 3 // (inplanes * 3 * 3 + 3 * planes)

    def bn_params(k, c):
        k1, k2, k3, k4 = jax.random.split(k, 4)
        return (jax.random.uniform(k1, (c,), minval=0.5, maxval=1.5),
                jax.random.normal(k2, (c,)) * 0.1,
                jax.random.normal(k3, (c,)) * 0.1,
                jax.random.uniform(k4, (c,), minval=0.5, maxval=1.5))

    ks = jax.random.split(key, 8)
    conv1 = dict(
        w_spatial=jax.random.normal(ks[0], (3, 3, inplanes, mid)) * 0.1,
        bn_mid=bn_params(ks[1], mid),
        w_temporal=jax.random.normal(ks[2], (3, mid, planes)) * 0.1,
        bn_out=bn_params(ks[3], planes),
    )
    conv2 = dict(
        w_spatial=jax.random.normal(ks[4], (3, 3, planes, mid)) * 0.1,
        bn_mid=bn_params(ks[5], mid),
        w_temporal=jax.random.normal(ks[6], (3, mid, planes)) * 0.1,
        bn_out=bn_params(ks[7], planes),
    )
    return dict(conv1=conv1, conv2=conv2)


def prepare_params(raw, eps=1e-5):
    """Fold inference-mode BN scale into the conv weights, cast weights to bf16."""
    def prep(c):
        s_mid, b_mid = fold_bn(c['bn_mid'], eps)
        s_out, b_out = fold_bn(c['bn_out'], eps)
        return dict(
            w_sp_f=(c['w_spatial'] * s_mid).astype(jnp.bfloat16),   # (3,3,Cin,mid)
            b_mid=b_mid.astype(jnp.float32),
            w_t_f=(c['w_temporal'] * s_out).astype(jnp.bfloat16),   # (3,mid,Cout)
            b_out=b_out.astype(jnp.float32),
        )
    return dict(conv1=prep(raw['conv1']), conv2=prep(raw['conv2']))


# ---------------------------------------------------------------------------
if __name__ == "__main__":
    key = jax.random.PRNGKey(0)
    kx, kp = jax.random.split(key)

    # Small test shapes (GEMM rows M = N*T*H*W = 512); real R(2+1)D shapes
    # (C=64-512, H/W=14-56) should be used before locking tile sizes.
    N, Cin, T, H, W = 2, 16, 4, 8, 8
    planes, stride = 16, 1                  # stride=1 / downsample=None case

    x = jax.random.normal(kx, (N, Cin, T, H, W), dtype=jnp.float32)
    params = prepare_params(init_params(kp, Cin, planes))

    fwd = jax.jit(functools.partial(basic_block_forward, stride=stride))
    out = jax.block_until_ready(fwd(x, params))

    ref = basic_block_reference(x, params, stride)
    assert out.shape == ref.shape, (out.shape, ref.shape)
    max_err = float(jnp.max(jnp.abs(out - ref)))
    assert jnp.allclose(out, ref, atol=1e-2, rtol=1e-2), max_err

    print("KERNEL_OK")
</pallas_src>

<mosaic_0001>
module attributes {stable_mosaic.version = 11 : i64} {
  func.func @_gemm_bias_kernel(%arg0: i32, %arg1: memref<512x144xbf16, #tpu.memory_space<vmem>>, %arg2: memref<144x36xbf16, #tpu.memory_space<vmem>>, %arg3: memref<1x36xf32, #tpu.memory_space<vmem>>, %arg4: memref<512x36xbf16, #tpu.memory_space<vmem>>) attributes {dimension_semantics = [#tpu.dimension_semantics<parallel>], iteration_bounds = array<i64: 1>, scalar_prefetch = 0 : i64, scratch_operands = 0 : i64, tpu.core_type = #tpu.core_type<tc>, window_params = [{transform_indices = @transform_0, window_bounds = array<i64: 512, 144>}, {pipeline_mode = #tpu.pipeline_mode<synchronous>, transform_indices = @transform_1, window_bounds = array<i64: 144, 36>}, {pipeline_mode = #tpu.pipeline_mode<synchronous>, transform_indices = @transform_2, window_bounds = array<i64: 1, 36>}, {transform_indices = @transform_3, window_bounds = array<i64: 512, 36>}]} {
    %c0 = arith.constant 0 : index
    %c0_0 = arith.constant 0 : index
    %0 = vector.load %arg1[%c0, %c0_0] : memref<512x144xbf16, #tpu.memory_space<vmem>>, vector<512x144xbf16>
    %c0_1 = arith.constant 0 : index
    %c0_2 = arith.constant 0 : index
    %1 = vector.load %arg2[%c0_1, %c0_2] : memref<144x36xbf16, #tpu.memory_space<vmem>>, vector<144x36xbf16>
    %cst = arith.constant dense<0.000000e+00> : vector<512x36xf32>
    %2 = tpu.matmul %0, %1, %cst {dimension_numbers = #tpu.dot_dimension_numbers<[1], [0], [0], [1], [0, 0, 1, 1], [], []>} : vector<512x144xbf16>, vector<144x36xbf16>, vector<512x36xf32> -> vector<512x36xf32>
    %c0_3 = arith.constant 0 : index
    %c0_4 = arith.constant 0 : index
    %3 = vector.load %arg3[%c0_3, %c0_4] : memref<1x36xf32, #tpu.memory_space<vmem>>, vector<1x36xf32>
    %4 = vector.broadcast %3 : vector<1x36xf32> to vector<512x36xf32>
    %5 = arith.addf %2, %4 : vector<512x36xf32>
    %cst_5 = arith.constant 0.000000e+00 : f32
    %6 = vector.broadcast %cst_5 : f32 to vector<512x36xf32>
    %7 = arith.maximumf %5, %6 : vector<512x36xf32>
    %8 = arith.truncf %7 : vector<512x36xf32> to vector<512x36xbf16>
    %c0_6 = arith.constant 0 : index
    %c0_7 = arith.constant 0 : index
    %9 = vector.load %arg4[%c0_6, %c0_7] : memref<512x36xbf16, #tpu.memory_space<vmem>>, vector<512x36xbf16>
    tpu.vector_store %arg4[%c0_6, %c0_7], %8 {strides = array<i32>} : memref<512x36xbf16, #tpu.memory_space<vmem>>, vector<512x36xbf16>,
    return
  }
  func.func @transform_0(%arg0: i32) -> (i32, i32) {
    %c0_i32 = arith.constant 0 : i32
    %c0_i32_0 = arith.constant 0 : i32
    return %arg0, %c0_i32 : i32, i32
  }
  func.func @transform_1(%arg0: i32) -> (i32, i32) {
    %c0_i32 = arith.constant 0 : i32
    %c0_i32_0 = arith.constant 0 : i32
    %c0_i32_1 = arith.constant 0 : i32
    return %c0_i32, %c0_i32_0 : i32, i32
  }
  func.func @transform_2(%arg0: i32) -> (i32, i32) {
    %c0_i32 = arith.constant 0 : i32
    %c0_i32_0 = arith.constant 0 : i32
    %c0_i32_1 = arith.constant 0 : i32
    return %c0_i32, %c0_i32_0 : i32, i32
  }
  func.func @transform_3(%arg0: i32) -> (i32, i32) {
    %c0_i32 = arith.constant 0 : i32
    %c0_i32_0 = arith.constant 0 : i32
    return %arg0, %c0_i32 : i32, i32
  }
}

module attributes {stable_mosaic.version = 11 : i64} {
  func.func @_temporal_tap_kernel(%arg0: i32, %arg1: i32, %arg2: i32, %arg3: memref<1x1x64x36xbf16, #tpu.memory_space<vmem>>, %arg4: memref<1x36x16xbf16, #tpu.memory_space<vmem>>, %arg5: memref<1x16xf32, #tpu.memory_space<vmem>>, %arg6: memref<1x1x64x16xbf16, #tpu.memory_space<vmem>>, %arg7: memref<64x16xf32, #tpu.memory_space<vmem>>) attributes {dimension_semantics = [#tpu.dimension_semantics<parallel>, #tpu.dimension_semantics<parallel>, #tpu.dimension_semantics<arbitrary>], iteration_bounds = array<i64: 2, 4, 3>, scalar_prefetch = 0 : i64, scratch_operands = 1 : i64, tpu.core_type = #tpu.core_type<tc>, window_params = [{transform_indices = @transform_0, window_bounds = array<i64: 1, 1, 64, 36>}, {transform_indices = @transform_1, window_bounds = array<i64: 1, 36, 16>}, {pipeline_mode = #tpu.pipeline_mode<synchronous>, transform_indices = @transform_2, window_bounds = array<i64: 1, 16>}, {transform_indices = @transform_3, window_bounds = array<i64: 1, 1, 64, 16>}]} {
    %c1_i32 = arith.constant 1 : i32
    %0 = arith.muli %arg1, %c1_i32 : i32
    %1 = arith.addi %0, %arg2 : i32
    %c1_i32_0 = arith.constant 1 : i32
    %2 = arith.subi %1, %c1_i32_0 : i32
    %c0_i32 = arith.constant 0 : i32
    %3 = arith.cmpi eq, %arg2, %c0_i32 : i32
    %4 = arith.extui %3 : i1 to i32
    %c0_i32_1 = arith.constant 0 : i32
    %5 = arith.cmpi ne, %4, %c0_i32_1 : i32
    scf.if %5 {
      %cst = arith.constant 0.000000e+00 : f32
      %14 = vector.broadcast %cst : f32 to vector<64x16xf32>
      %c0 = arith.constant 0 : index
      %c0_5 = arith.constant 0 : index
      %15 = vector.load %arg7[%c0, %c0_5] : memref<64x16xf32, #tpu.memory_space<vmem>>, vector<64x16xf32>
      tpu.vector_store %arg7[%c0, %c0_5], %14 {strides = array<i32>} : memref<64x16xf32, #tpu.memory_space<vmem>>, vector<64x16xf32>,
    } else {
    }
    %c0_i32_2 = arith.constant 0 : i32
    %6 = arith.cmpi sge, %2, %c0_i32_2 : i32
    %c4_i32 = arith.constant 4 : i32
    %7 = arith.cmpi slt, %2, %c4_i32 : i32
    %8 = arith.andi %6, %7 : i1
    %9 = arith.extui %8 : i1 to i32
    %c0_i32_3 = arith.constant 0 : i32
    %10 = arith.cmpi ne, %9, %c0_i32_3 : i32
    scf.if %10 {
      %c0 = arith.constant 0 : index
      %c0_5 = arith.constant 0 : index
      %14 = vector.load %arg7[%c0, %c0_5] : memref<64x16xf32, #tpu.memory_space<vmem>>, vector<64x16xf32>
      %c0_6 = arith.constant 0 : index
      %c0_7 = arith.constant 0 : index
      %c0_8 = arith.constant 0 : index
      %c0_9 = arith.constant 0 : index
      %15 = vector.load %arg3[%c0_6, %c0_7, %c0_8, %c0_9] : memref<1x1x64x36xbf16, #tpu.memory_space<vmem>>, vector<1x1x64x36xbf16>
      %16 = vector.shape_cast %15 : vector<1x1x64x36xbf16> to vector<64x36xbf16>
      %c0_10 = arith.constant 0 : index
      %c0_11 = arith.constant 0 : index
      %c0_12 = arith.constant 0 : index
      %17 = vector.load %arg4[%c0_10, %c0_11, %c0_12] : memref<1x36x16xbf16, #tpu.memory_space<vmem>>, vector<1x36x16xbf16>
      %18 = vector.shape_cast %17 : vector<1x36x16xbf16> to vector<36x16xbf16>
      %cst = arith.constant dense<0.000000e+00> : vector<64x16xf32>
      %19 = tpu.matmul %16, %18, %cst {dimension_numbers = #tpu.dot_dimension_numbers<[1], [0], [0], [1], [0, 0, 1, 1], [], []>} : vector<64x36xbf16>, vector<36x16xbf16>, vector<64x16xf32> -> vector<64x16xf32>
      %20 = arith.addf %14, %19 : vector<64x16xf32>
      %c0_13 = arith.constant 0 : index
      %c0_14 = arith.constant 0 : index
      %21 = vector.load %arg7[%c0_13, %c0_14] : memref<64x16xf32, #tpu.memory_space<vmem>>, vector<64x16xf32>
      tpu.vector_store %arg7[%c0_13, %c0_14], %20 {strides = array<i32>} : memref<64x16xf32, #tpu.memory_space<vmem>>, vector<64x16xf32>,
    } else {
    }
    %c2_i32 = arith.constant 2 : i32
    %11 = arith.cmpi eq, %arg2, %c2_i32 : i32
    %12 = arith.extui %11 : i1 to i32
    %c0_i32_4 = arith.constant 0 : i32
    %13 = arith.cmpi ne, %12, %c0_i32_4 : i32
    scf.if %13 {
      %c0 = arith.constant 0 : index
      %c0_5 = arith.constant 0 : index
      %14 = vector.load %arg7[%c0, %c0_5] : memref<64x16xf32, #tpu.memory_space<vmem>>, vector<64x16xf32>
      %c0_6 = arith.constant 0 : index
      %c0_7 = arith.constant 0 : index
      %15 = vector.load %arg5[%c0_6, %c0_7] : memref<1x16xf32, #tpu.memory_space<vmem>>, vector<1x16xf32>
      %16 = vector.broadcast %15 : vector<1x16xf32> to vector<64x16xf32>
      %17 = arith.addf %14, %16 : vector<64x16xf32>
      %cst = arith.constant 0.000000e+00 : f32
      %18 = vector.broadcast %cst : f32 to vector<64x16xf32>
      %19 = arith.maximumf %17, %18 : vector<64x16xf32>
      %20 = arith.truncf %19 : vector<64x16xf32> to vector<64x16xbf16>
      %c0_8 = arith.constant 0 : index
      %c0_9 = arith.constant 0 : index
      %c0_10 = arith.constant 0 : index
      %c0_11 = arith.constant 0 : index
      %21 = vector.load %arg6[%c0_8, %c0_9, %c0_10, %c0_11] : memref<1x1x64x16xbf16, #tpu.memory_space<vmem>>, vector<1x1x64x16xbf16>
      %22 = vector.shape_cast %21 : vector<1x1x64x16xbf16> to vector<64x16xbf16>
      %23 = vector.shape_cast %20 : vector<64x16xbf16> to vector<1x1x64x16xbf16>
      tpu.vector_store %arg6[%c0_8, %c0_9, %c0_10, %c0_11], %23 {strides = array<i32>} : memref<1x1x64x16xbf16, #tpu.memory_space<vmem>>, vector<1x1x64x16xbf16>,
    } else {
    }
    return
  }
  func.func @transform_0(%arg0: i32, %arg1: i32, %arg2: i32) -> (i32, i32, i32, i32) {
    %c1_i32 = arith.constant 1 : i32
    %0 = arith.muli %arg1, %c1_i32 : i32
    %1 = arith.addi %0, %arg2 : i32
    %c1_i32_0 = arith.constant 1 : i32
    %2 = arith.subi %1, %c1_i32_0 : i32
    %c0_i32 = arith.constant 0 : i32
    %c3_i32 = arith.constant 3 : i32
    %3 = arith.maxsi %c0_i32, %2 : i32
    %4 = arith.minsi %c3_i32, %3 : i32
    %c0_i32_1 = arith.constant 0 : i32
    %c0_i32_2 = arith.constant 0 : i32
    %c0_i32_3 = arith.constant 0 : i32
    return %arg0, %4, %c0_i32_1, %c0_i32_2 : i32, i32, i32, i32
  }
  func.func @transform_1(%arg0: i32, %arg1: i32, %arg2: i32) -> (i32, i32, i32) {
    %c0_i32 = arith.constant 0 : i32
    %c0_i32_0 = arith.constant 0 : i32
    %c0_i32_1 = arith.constant 0 : i32
    return %arg2, %c0_i32, %c0_i32_0 : i32, i32, i32
  }
  func.func @transform_2(%arg0: i32, %arg1: i32, %arg2: i32) -> (i32, i32) {
    %c0_i32 = arith.constant 0 : i32
    %c0_i32_0 = arith.constant 0 : i32
    %c0_i32_1 = arith.constant 0 : i32
    return %c0_i32, %c0_i32_0 : i32, i32
  }
  func.func @transform_3(%arg0: i32, %arg1: i32, %arg2: i32) -> (i32, i32, i32, i32) {
    %c0_i32 = arith.constant 0 : i32
    %c0_i32_0 = arith.constant 0 : i32
    %c0_i32_1 = arith.constant 0 : i32
    return %arg0, %arg1, %c0_i32, %c0_i32_0 : i32, i32, i32, i32
  }
}

module attributes {stable_mosaic.version = 11 : i64} {
  func.func @_temporal_tap_res_kernel(%arg0: i32, %arg1: i32, %arg2: i32, %arg3: memref<1x1x64x36xbf16, #tpu.memory_space<vmem>>, %arg4: memref<1x36x16xbf16, #tpu.memory_space<vmem>>, %arg5: memref<1x16xf32, #tpu.memory_space<vmem>>, %arg6: memref<1x1x64x16xf32, #tpu.memory_space<vmem>>, %arg7: memref<1x1x64x16xf32, #tpu.memory_space<vmem>>, %arg8: memref<64x16xf32, #tpu.memory_space<vmem>>) attributes {dimension_semantics = [#tpu.dimension_semantics<parallel>, #tpu.dimension_semantics<parallel>, #tpu.dimension_semantics<arbitrary>], iteration_bounds = array<i64: 2, 4, 3>, scalar_prefetch = 0 : i64, scratch_operands = 1 : i64, tpu.core_type = #tpu.core_type<tc>, window_params = [{transform_indices = @transform_0, window_bounds = array<i64: 1, 1, 64, 36>}, {transform_indices = @transform_1, window_bounds = array<i64: 1, 36, 16>}, {pipeline_mode = #tpu.pipeline_mode<synchronous>, transform_indices = @transform_2, window_bounds = array<i64: 1, 16>}, {transform_indices = @transform_3, window_bounds = array<i64: 1, 1, 64, 16>}, {transform_indices = @transform_4, window_bounds = array<i64: 1, 1, 64, 16>}]} {
    %c1_i32 = arith.constant 1 : i32
    %0 = arith.muli %arg1, %c1_i32 : i32
    %1 = arith.addi %0, %arg2 : i32
    %c1_i32_0 = arith.constant 1 : i32
    %2 = arith.subi %1, %c1_i32_0 : i32
    %c0_i32 = arith.constant 0 : i32
    %3 = arith.cmpi eq, %arg2, %c0_i32 : i32
    %4 = arith.extui %3 : i1 to i32
    %c0_i32_1 = arith.constant 0 : i32
    %5 = arith.cmpi ne, %4, %c0_i32_1 : i32
    scf.if %5 {
      %cst = arith.constant 0.000000e+00 : f32
      %14 = vector.broadcast %cst : f32 to vector<64x16xf32>
      %c0 = arith.constant 0 : index
      %c0_5 = arith.constant 0 : index
      %15 = vector.load %arg8[%c0, %c0_5] : memref<64x16xf32, #tpu.memory_space<vmem>>, vector<64x16xf32>
      tpu.vector_store %arg8[%c0, %c0_5], %14 {strides = array<i32>} : memref<64x16xf32, #tpu.memory_space<vmem>>, vector<64x16xf32>,
    } else {
    }
    %c0_i32_2 = arith.constant 0 : i32
    %6 = arith.cmpi sge, %2, %c0_i32_2 : i32
    %c4_i32 = arith.constant 4 : i32
    %7 = arith.cmpi slt, %2, %c4_i32 : i32
    %8 = arith.andi %6, %7 : i1
    %9 = arith.extui %8 : i1 to i32
    %c0_i32_3 = arith.constant 0 : i32
    %10 = arith.cmpi ne, %9, %c0_i32_3 : i32
    scf.if %10 {
      %c0 = arith.constant 0 : index
      %c0_5 = arith.constant 0 : index
      %14 = vector.load %arg8[%c0, %c0_5] : memref<64x16xf32, #tpu.memory_space<vmem>>, vector<64x16xf32>
      %c0_6 = arith.constant 0 : index
      %c0_7 = arith.constant 0 : index
      %c0_8 = arith.constant 0 : index
      %c0_9 = arith.constant 0 : index
      %15 = vector.load %arg3[%c0_6, %c0_7, %c0_8, %c0_9] : memref<1x1x64x36xbf16, #tpu.memory_space<vmem>>, vector<1x1x64x36xbf16>
      %16 = vector.shape_cast %15 : vector<1x1x64x36xbf16> to vector<64x36xbf16>
      %c0_10 = arith.constant 0 : index
      %c0_11 = arith.constant 0 : index
      %c0_12 = arith.constant 0 : index
      %17 = vector.load %arg4[%c0_10, %c0_11, %c0_12] : memref<1x36x16xbf16, #tpu.memory_space<vmem>>, vector<1x36x16xbf16>
      %18 = vector.shape_cast %17 : vector<1x36x16xbf16> to vector<36x16xbf16>
      %cst = arith.constant dense<0.000000e+00> : vector<64x16xf32>
      %19 = tpu.matmul %16, %18, %cst {dimension_numbers = #tpu.dot_dimension_numbers<[1], [0], [0], [1], [0, 0, 1, 1], [], []>} : vector<64x36xbf16>, vector<36x16xbf16>, vector<64x16xf32> -> vector<64x16xf32>
      %20 = arith.addf %14, %19 : vector<64x16xf32>
      %c0_13 = arith.constant 0 : index
      %c0_14 = arith.constant 0 : index
      %21 = vector.load %arg8[%c0_13, %c0_14] : memref<64x16xf32, #tpu.memory_space<vmem>>, vector<64x16xf32>
      tpu.vector_store %arg8[%c0_13, %c0_14], %20 {strides = array<i32>} : memref<64x16xf32, #tpu.memory_space<vmem>>, vector<64x16xf32>,
    } else {
    }
    %c2_i32 = arith.constant 2 : i32
    %11 = arith.cmpi eq, %arg2, %c2_i32 : i32
    %12 = arith.extui %11 : i1 to i32
    %c0_i32_4 = arith.constant 0 : i32
    %13 = arith.cmpi ne, %12, %c0_i32_4 : i32
    scf.if %13 {
      %c0 = arith.constant 0 : index
      %c0_5 = arith.constant 0 : index
      %14 = vector.load %arg8[%c0, %c0_5] : memref<64x16xf32, #tpu.memory_space<vmem>>, vector<64x16xf32>
      %c0_6 = arith.constant 0 : index
      %c0_7 = arith.constant 0 : index
      %15 = vector.load %arg5[%c0_6, %c0_7] : memref<1x16xf32, #tpu.memory_space<vmem>>, vector<1x16xf32>
      %16 = vector.broadcast %15 : vector<1x16xf32> to vector<64x16xf32>
      %17 = arith.addf %14, %16 : vector<64x16xf32>
      %c0_8 = arith.constant 0 : index
      %c0_9 = arith.constant 0 : index
      %c0_10 = arith.constant 0 : index
      %c0_11 = arith.constant 0 : index
      %18 = vector.load %arg6[%c0_8, %c0_9, %c0_10, %c0_11] : memref<1x1x64x16xf32, #tpu.memory_space<vmem>>, vector<1x1x64x16xf32>
      %19 = vector.shape_cast %18 : vector<1x1x64x16xf32> to vector<64x16xf32>
      %20 = arith.addf %17, %19 : vector<64x16xf32>
      %cst = arith.constant 0.000000e+00 : f32
      %21 = vector.broadcast %cst : f32 to vector<64x16xf32>
      %22 = arith.maximumf %20, %21 : vector<64x16xf32>
      %c0_12 = arith.constant 0 : index
      %c0_13 = arith.constant 0 : index
      %c0_14 = arith.constant 0 : index
      %c0_15 = arith.constant 0 : index
      %23 = vector.load %arg7[%c0_12, %c0_13, %c0_14, %c0_15] : memref<1x1x64x16xf32, #tpu.memory_space<vmem>>, vector<1x1x64x16xf32>
      %24 = vector.shape_cast %23 : vector<1x1x64x16xf32> to vector<64x16xf32>
      %25 = vector.shape_cast %22 : vector<64x16xf32> to vector<1x1x64x16xf32>
      tpu.vector_store %arg7[%c0_12, %c0_13, %c0_14, %c0_15], %25 {strides = array<i32>} : memref<1x1x64x16xf32, #tpu.memory_space<vmem>>, vector<1x1x64x16xf32>,
    } else {
    }
    return
  }
  func.func @transform_0(%arg0: i32, %arg1: i32, %arg2: i32) -> (i32, i32, i32, i32) {
    %c1_i32 = arith.constant 1 : i32
    %0 = arith.muli %arg1, %c1_i32 : i32
    %1 = arith.addi %0, %arg2 : i32
    %c1_i32_0 = arith.constant 1 : i32
    %2 = arith.subi %1, %c1_i32_0 : i32
    %c0_i32 = arith.constant 0 : i32
    %c3_i32 = arith.constant 3 : i32
    %3 = arith.maxsi %c0_i32, %2 : i32
    %4 = arith.minsi %c3_i32, %3 : i32
    %c0_i32_1 = arith.constant 0 : i32
    %c0_i32_2 = arith.constant 0 : i32
    %c0_i32_3 = arith.constant 0 : i32
    return %arg0, %4, %c0_i32_1, %c0_i32_2 : i32, i32, i32, i32
  }
  func.func @transform_1(%arg0: i32, %arg1: i32, %arg2: i32) -> (i32, i32, i32) {
    %c0_i32 = arith.constant 0 : i32
    %c0_i32_0 = arith.constant 0 : i32
    %c0_i32_1 = arith.constant 0 : i32
    return %arg2, %c0_i32, %c0_i32_0 : i32, i32, i32
  }
  func.func @transform_2(%arg0: i32, %arg1: i32, %arg2: i32) -> (i32, i32) {
    %c0_i32 = arith.constant 0 : i32
    %c0_i32_0 = arith.constant 0 : i32
    %c0_i32_1 = arith.constant 0 : i32
    return %c0_i32, %c0_i32_0 : i32, i32
  }
  func.func @transform_3(%arg0: i32, %arg1: i32, %arg2: i32) -> (i32, i32, i32, i32) {
    %c0_i32 = arith.constant 0 : i32
    %c0_i32_0 = arith.constant 0 : i32
    %c0_i32_1 = arith.constant 0 : i32
    return %arg0, %arg1, %c0_i32, %c0_i32_0 : i32, i32, i32, i32
  }
  func.func @transform_4(%arg0: i32, %arg1: i32, %arg2: i32) -> (i32, i32, i32, i32) {
    %c0_i32 = arith.constant 0 : i32
    %c0_i32_0 = arith.constant 0 : i32
    %c0_i32_1 = arith.constant 0 : i32
    return %arg0, %arg1, %c0_i32, %c0_i32_0 : i32, i32, i32, i32
  }
}

</mosaic_0001>

<bundles_post_ra>
// kernel: basic_block_forward.4
= control target key start
LH: loop header
LB: loop body
LE: loop exit
PB: predicated region body
PF: predicated region fallthrough
CT: control target
= control target key end

     0   :  { %vm443_vm0 = vcmask 130048   ;;  %vm1006_vm1 = vcmask 289792   ;;  %s2356_s1 = inlined_call_operand.vmem [shape: bf16[144,36], index: 1, kind: input, shape index: {}]   ;;  %s2357_s0 = inlined_call_operand.vmem [shape: bf16[512,144], index: 0, kind: input, shape index: {}]   ;;  %s2358_s2 = inlined_call_operand.vmem [shape: f32[1,36], index: 2, kind: input, shape index: {}]   ;;  %s2359_s3 = inlined_call_operand.vmem [shape: bf16[512,36], index: 3, kind: output, shape index: {}]  }
   0x1   :  { %v1470_v0 = vld [vmem:[%s2356_s1 + $0x38] sm:$0xff]  ;;  %v1471_v1 = vld [vmem:[%s2356_s1 + $0x40] sm:$0xff]  ;;  %v1079_v3 = vld [vmem:[%s2357_s0 + $0x8] sm:$0xf0] }
   0x2   :  { %v1399_v2 = vld [vmem:[%s2357_s0 + $0x4] sm:$0xf]  ;;  %540 = vmatpush.bf16.msra.mxu0 %v1470_v0  ;;  %1472 = vmatpush.bf16.msra.mxu2 %v1470_v0  ;;  %v1469_v5 = vld [vmem:[%s2356_s1 + $0x30] sm:$0xff]  ;;  %v1468_v6 = vld [vmem:[%s2356_s1 + $0x28] sm:$0xff] }
   0x3   :  { %v1082_v4 = vor.u32 %v1399_v2, %v1079_v3  ;;  %716 = vmatpush.bf16.msra.mxu1 %v1471_v1  ;;  %1480 = vmatpush.bf16.msra.mxu3 %v1471_v1  ;;  %v1433_v7 = vld [vmem:[%s2357_s0 + $0x114] sm:$0xf]  ;;  %v1215_v8 = vld [vmem:[%s2357_s0 + $0x118] sm:$0xf0]  ;;  %v1467_v10 = vld [vmem:[%s2356_s1 + $0x20] sm:$0xff] }
   0x4   :  { %v1218_v9 = vor.u32 %v1433_v7, %v1215_v8  ;;  %v1466_v11 = vld [vmem:[%s2356_s1 + $0x18] sm:$0xff]  ;;  %v1401_v12 = vld [vmem:[%s2357_s0 + $0x14] sm:$0xf]  ;;  %v1464_v16 = vld [vmem:[%s2356_s1 + $0x8] sm:$0xff] }
   0x5   :  { %v1087_v13 = vld [vmem:[%s2357_s0 + $0x18] sm:$0xf0]  ;;  %v1465_v15 = vld [vmem:[%s2356_s1 + $0x10] sm:$0xff]  ;;  %v1435_v17 = vld [vmem:[%s2357_s0 + $0x124] sm:$0xf] }
   0x6   :  { %1367 = vmatmul.msk.bf16.vlgmr.msra.gmra.mxu1 %vm443_vm0, %v1082_v4  ;;  %541 = vmatpush.bf16.msra.mxu0 %v1469_v5  ;;  %v1090_v14 = vor.u32 %v1401_v12, %v1087_v13  ;;  %v1223_v18 = vld [vmem:[%s2357_s0 + $0x128] sm:$0xf0]  ;;  %v1463_v20 = vld [vmem:[%s2356_s1] sm:$0xff]  ;;  %v1400_v22 = vld [vmem:[%s2357_s0 + $0x4] sm:$0xf0] }
   0x7   :  { %1473 = vmatpush.bf16.msra.mxu2 %v1469_v5  ;;  %1384 = vmatmul.msk.bf16.vlgmr.msra.gmra.mxu3 %vm443_vm0, %v1218_v9  ;;  %v1226_v19 = vor.u32 %v1435_v17, %v1223_v18  ;;  %v1077_v21 = vld [vmem:[%s2357_s0] sm:$0xf]  ;;  %v1432_v24 = vld [vmem:[%s2357_s0 + $0x104] sm:$0xf0]  ;;  %v1403_v27 = vld [vmem:[%s2357_s0 + $0x24] sm:$0xf] }
   0x8   :  { %v1205_v23 = vld [vmem:[%s2357_s0 + $0x100] sm:$0xf]  ;;  %v1078_v25 = vor.u32 %v1400_v22, %v1077_v21  ;;  %v1095_v28 = vld [vmem:[%s2357_s0 + $0x28] sm:$0xf0]  ;;  %v1437_v30 = vld [vmem:[%s2357_s0 + $0x134] sm:$0xf] }
   0x9   :  { %v1206_v26 = vor.u32 %v1432_v24, %v1205_v23  ;;  %v1098_v29 = vor.u32 %v1403_v27, %v1095_v28  ;;  %v1231_v31 = vld [vmem:[%s2357_s0 + $0x138] sm:$0xf0]  ;;  %v1085_v33 = vld [vmem:[%s2357_s0 + $0x10] sm:$0xf]  ;;  %v1402_v34 = vld [vmem:[%s2357_s0 + $0x14] sm:$0xf0] }
   0xa   :  { %542 = vmatpush.bf16.msra.mxu0 %v1468_v6  ;;  %v1234_v32 = vor.u32 %v1437_v30, %v1231_v31  ;;  %v1213_v35 = vld [vmem:[%s2357_s0 + $0x110] sm:$0xf]  ;;  %v1434_v36 = vld [vmem:[%s2357_s0 + $0x114] sm:$0xf0]  ;;  %v1086_v37 = vor.u32 %v1402_v34, %v1085_v33  ;;  %v1405_v39 = vld [vmem:[%s2357_s0 + $0x34] sm:$0xf] }
   0xb   :  { %1474 = vmatpush.bf16.msra.mxu2 %v1468_v6  ;;  %v1214_v38 = vor.u32 %v1434_v36, %v1213_v35  ;;  %v1103_v40 = vld [vmem:[%s2357_s0 + $0x38] sm:$0xf0]  ;;  %v1439_v42 = vld [vmem:[%s2357_s0 + $0x144] sm:$0xf]  ;;  %v1239_v43 = vld [vmem:[%s2357_s0 + $0x148] sm:$0xf0] }
   0xc   :  { %v1106_v41 = vor.u32 %v1405_v39, %v1103_v40  ;;  %v1242_v44 = vor.u32 %v1439_v42, %v1239_v43  ;;  %v1093_v45 = vld [vmem:[%s2357_s0 + $0x20] sm:$0xf]  ;;  %v1404_v46 = vld [vmem:[%s2357_s0 + $0x24] sm:$0xf0]  ;;  %v1407_v51 = vld [vmem:[%s2357_s0 + $0x44] sm:$0xf] }
   0xd   :  { %v1221_v47 = vld [vmem:[%s2357_s0 + $0x120] sm:$0xf]  ;;  %v1436_v48 = vld [vmem:[%s2357_s0 + $0x124] sm:$0xf0]  ;;  %v1094_v49 = vor.u32 %v1404_v46, %v1093_v45  ;;  %v1111_v52 = vld [vmem:[%s2357_s0 + $0x48] sm:$0xf0] }
   0xe   :  { %543 = vmatpush.bf16.msra.mxu0 %v1467_v10  ;;  %v1222_v50 = vor.u32 %v1436_v48, %v1221_v47  ;;  %v1114_v53 = vor.u32 %v1407_v51, %v1111_v52  ;;  %v1441_v54 = vld [vmem:[%s2357_s0 + $0x154] sm:$0xf]  ;;  %v1247_v55 = vld [vmem:[%s2357_s0 + $0x158] sm:$0xf0]  ;;  %v1101_v57 = vld [vmem:[%s2357_s0 + $0x30] sm:$0xf] }
   0xf   :  { %1475 = vmatpush.bf16.msra.mxu2 %v1467_v10  ;;  %v1250_v56 = vor.u32 %v1441_v54, %v1247_v55  ;;  %v1406_v58 = vld [vmem:[%s2357_s0 + $0x34] sm:$0xf0]  ;;  %v1229_v59 = vld [vmem:[%s2357_s0 + $0x130] sm:$0xf]  ;;  %v1409_v63 = vld [vmem:[%s2357_s0 + $0x54] sm:$0xf] }
  0x10   :  { %v1438_v60 = vld [vmem:[%s2357_s0 + $0x134] sm:$0xf0]  ;;  %v1102_v61 = vor.u32 %v1406_v58, %v1101_v57  ;;  %v1119_v0 = vld [vmem:[%s2357_s0 + $0x58] sm:$0xf0]  ;;  %v1443_v2 = vld [vmem:[%s2357_s0 + $0x164] sm:$0xf] }
  0x11   :  { %v1230_v62 = vor.u32 %v1438_v60, %v1229_v59  ;;  %v1122_v1 = vor.u32 %v1409_v63, %v1119_v0  ;;  %v1255_v3 = vld [vmem:[%s2357_s0 + $0x168] sm:$0xf0]  ;;  %v1109_v5 = vld [vmem:[%s2357_s0 + $0x40] sm:$0xf]  ;;  %v1408_v6 = vld [vmem:[%s2357_s0 + $0x44] sm:$0xf0] }
  0x12   :  { %544 = vmatpush.bf16.msra.mxu0 %v1466_v11  ;;  %v1258_v4 = vor.u32 %v1443_v2, %v1255_v3  ;;  %v1237_v7 = vld [vmem:[%s2357_s0 + $0x140] sm:$0xf]  ;;  %v1440_v8 = vld [vmem:[%s2357_s0 + $0x144] sm:$0xf0]  ;;  %v1110_v9 = vor.u32 %v1408_v6, %v1109_v5  ;;  %v1127_v12 = vld [vmem:[%s2357_s0 + $0x68] sm:$0xf0] }
  0x13   :  { %1476 = vmatpush.bf16.msra.mxu2 %v1466_v11  ;;  %v1238_v10 = vor.u32 %v1440_v8, %v1237_v7  ;;  %v1411_v11 = vld [vmem:[%s2357_s0 + $0x64] sm:$0xf]  ;;  %v1410_v17 = vld [vmem:[%s2357_s0 + $0x54] sm:$0xf0]  ;;  %v1413_v23 = vld [vmem:[%s2357_s0 + $0x74] sm:$0xf] }
  0x14   :  { %v1130_v13 = vor.u32 %v1411_v11, %v1127_v12  ;;  %v1135_v24 = vld [vmem:[%s2357_s0 + $0x78] sm:$0xf0]  ;;  %v1271_v27 = vld [vmem:[%s2357_s0 + $0x188] sm:$0xf0]  ;;  %v1125_v28 = vld [vmem:[%s2357_s0 + $0x60] sm:$0xf] }
  0x15   :  { %v1253_v31 = vld [vmem:[%s2357_s0 + $0x160] sm:$0xf]  ;;  %v1415_v35 = vld [vmem:[%s2357_s0 + $0x84] sm:$0xf]  ;;  %v1143_v36 = vld [vmem:[%s2357_s0 + $0x88] sm:$0xf0] }
  0x16   :  { %1368 = vmatmul.msk.bf16.gmra.mxu1 %vm443_vm0, %v1090_v14  ;;  %545 = vmatpush.bf16.msra.mxu0 %v1465_v15  ;;  %v1445_v14 = vld [vmem:[%s2357_s0 + $0x174] sm:$0xf]  ;;  %v1279_v40 = vld [vmem:[%s2357_s0 + $0x198] sm:$0xf0]  ;;  %v1414_v42 = vld [vmem:[%s2357_s0 + $0x74] sm:$0xf0] }
  0x17   :  { %1477 = vmatpush.bf16.msra.mxu2 %v1465_v15  ;;  %1385 = vmatmul.msk.bf16.gmra.mxu3 %vm443_vm0, %v1226_v19  ;;  %v1263_v15 = vld [vmem:[%s2357_s0 + $0x178] sm:$0xf0]  ;;  %v1245_v19 = vld [vmem:[%s2357_s0 + $0x150] sm:$0xf]  ;;  %v1449_v39 = vld [vmem:[%s2357_s0 + $0x194] sm:$0xf] }
  0x18   :  { %v1266_v18 = vor.u32 %v1445_v14, %v1263_v15  ;;  %v1282_v43 = vor.u32 %v1449_v39, %v1279_v40  ;;  %v1261_v45 = vld [vmem:[%s2357_s0 + $0x170] sm:$0xf]  ;;  %v1446_v46 = vld [vmem:[%s2357_s0 + $0x174] sm:$0xf0]  ;;  %v1451_v55 = vld [vmem:[%s2357_s0 + $0x1a4] sm:$0xf] }
  0x19   :  { %v1262_v48 = vor.u32 %v1446_v46, %v1261_v45  ;;  %v1141_v57 = vld [vmem:[%s2357_s0 + $0x80] sm:$0xf]  ;;  %v1416_v58 = vld [vmem:[%s2357_s0 + $0x84] sm:$0xf0]  ;;  %v1159_v5 = vld [vmem:[%s2357_s0 + $0xa8] sm:$0xf0] }
  0x1a   :  { %546 = vmatpush.bf16.msra.mxu0 %v1464_v16  ;;  %v1448_v63 = vld [vmem:[%s2357_s0 + $0x184] sm:$0xf0]  ;;  %v1142_v0 = vor.u32 %v1416_v58, %v1141_v57 }
  0x1b   :  { %1478 = vmatpush.bf16.msra.mxu2 %v1464_v16  ;;  %v1117_v16 = vld [vmem:[%s2357_s0 + $0x50] sm:$0xf]  ;;  %v1452_v57 = vld [vmem:[%s2357_s0 + $0x1a4] sm:$0xf0] }
  0x1c   :  { %v1118_v21 = vor.u32 %v1410_v17, %v1117_v16  ;;  %v1453_v17 = vld [vmem:[%s2357_s0 + $0x1b4] sm:$0xf] }
  0x1e   :  { %547 = vmatpush.bf16.msra.mxu0 %v1463_v20 }
  0x1f   :  { %1479 = vmatpush.bf16.msra.mxu2 %v1463_v20  ;;  %v1442_v20 = vld [vmem:[%s2357_s0 + $0x154] sm:$0xf0] }
  0x20   :  { %v1246_v22 = vor.u32 %v1442_v20, %v1245_v19  ;;  %v1149_v19 = vld [vmem:[%s2357_s0 + $0x90] sm:$0xf]  ;;  %v1418_v20 = vld [vmem:[%s2357_s0 + $0x94] sm:$0xf0] }
  0x21   :  { %548 = vmatmul.bf16.vlgmr.msra.gmra.mxu0 %v1078_v25  ;;  %v1138_v25 = vor.u32 %v1413_v23, %v1135_v24  ;;  %v1277_v24 = vld [vmem:[%s2357_s0 + $0x190] sm:$0xf] }
  0x22   :  { %628 = vmatmul.bf16.vlgmr.msra.gmra.mxu2 %v1206_v26  ;;  %v1447_v26 = vld [vmem:[%s2357_s0 + $0x184] sm:$0xf] }
  0x23   :  { %v1274_v30 = vor.u32 %v1447_v26, %v1271_v27 }
  0x26   :  { %1369 = vmatmul.msk.bf16.gmra.mxu1 %vm443_vm0, %v1098_v29  ;;  %v1412_v29 = vld [vmem:[%s2357_s0 + $0x64] sm:$0xf0] }
  0x27   :  { %1386 = vmatmul.msk.bf16.gmra.mxu3 %vm443_vm0, %v1234_v32  ;;  %v1444_v32 = vld [vmem:[%s2357_s0 + $0x164] sm:$0xf0]  ;;  %v1126_v33 = vor.u32 %v1412_v29, %v1125_v28  ;;  %v1150_v28 = vor.u32 %v1418_v20, %v1149_v19 }
  0x28   :  { %v1254_v34 = vor.u32 %v1444_v32, %v1253_v31  ;;  %v1421_v32 = vld [vmem:[%s2357_s0 + $0xb4] sm:$0xf] }
  0x31   :  { %553 = vmatmul.bf16.gmra.mxu0 %v1086_v37  ;;  %v1146_v37 = vor.u32 %v1415_v35, %v1143_v36 }
  0x32   :  { %633 = vmatmul.bf16.gmra.mxu2 %v1214_v38 }
  0x36   :  { %1370 = vmatmul.msk.bf16.gmra.mxu1 %vm443_vm0, %v1106_v41  ;;  %v1133_v41 = vld [vmem:[%s2357_s0 + $0x70] sm:$0xf] }
  0x37   :  { %1387 = vmatmul.msk.bf16.gmra.mxu3 %vm443_vm0, %v1242_v44  ;;  %v1134_v47 = vor.u32 %v1414_v42, %v1133_v41 }
  0x41   :  { %558 = vmatmul.bf16.gmra.mxu0 %v1094_v49  ;;  %v1417_v49 = vld [vmem:[%s2357_s0 + $0x94] sm:$0xf] }
  0x42   :  { %638 = vmatmul.bf16.gmra.mxu2 %v1222_v50  ;;  %v1151_v50 = vld [vmem:[%s2357_s0 + $0x98] sm:$0xf0] }
  0x43   :  { %v1154_v52 = vor.u32 %v1417_v49, %v1151_v50  ;;  %v1157_v50 = vld [vmem:[%s2357_s0 + $0xa0] sm:$0xf] }
  0x46   :  { %1371 = vmatmul.msk.bf16.gmra.mxu1 %vm443_vm0, %v1114_v53 }
  0x47   :  { %1388 = vmatmul.msk.bf16.gmra.mxu3 %vm443_vm0, %v1250_v56  ;;  %v1287_v56 = vld [vmem:[%s2357_s0 + $0x1a8] sm:$0xf0] }
  0x48   :  { %v1290_v59 = vor.u32 %v1451_v55, %v1287_v56  ;;  %v1285_v56 = vld [vmem:[%s2357_s0 + $0x1a0] sm:$0xf] }
  0x51   :  { %563 = vmatmul.bf16.gmra.mxu0 %v1102_v61  ;;  %v1780_v61 = vld [vmem:[%s2358_s2] ss:$0 sm:$0xff] }
  0x52   :  { %643 = vmatmul.bf16.gmra.mxu2 %v1230_v62  ;;  %v1269_v62 = vld [vmem:[%s2357_s0 + $0x180] sm:$0xf] }
  0x53   :  { %v1270_v2 = vor.u32 %v1448_v63, %v1269_v62 }
  0x56   :  { %1372 = vmatmul.msk.bf16.gmra.mxu1 %vm443_vm0, %v1122_v1 }
  0x57   :  { %1389 = vmatmul.msk.bf16.gmra.mxu3 %vm443_vm0, %v1258_v4  ;;  %v1419_v4 = vld [vmem:[%s2357_s0 + $0xa4] sm:$0xf] }
  0x58   :  { %v1162_v8 = vor.u32 %v1419_v4, %v1159_v5  ;;  %v1175_v4 = vld [vmem:[%s2357_s0 + $0xc8] sm:$0xf0] }
  0x61   :  { %568 = vmatmul.bf16.gmra.mxu0 %v1110_v9 }
  0x62   :  { %648 = vmatmul.bf16.gmra.mxu2 %v1238_v10 }
  0x66   :  { %1373 = vmatmul.msk.bf16.gmra.mxu1 %vm443_vm0, %v1130_v13 }
  0x67   :  { %1390 = vmatmul.msk.bf16.gmra.mxu3 %vm443_vm0, %v1266_v18  ;;  %v1295_v18 = vld [vmem:[%s2357_s0 + $0x1b8] sm:$0xf0] }
  0x71   :  { %573 = vmatmul.bf16.gmra.mxu0 %v1118_v21  ;;  %v1298_v21 = vor.u32 %v1453_v17, %v1295_v18 }
  0x72   :  { %653 = vmatmul.bf16.gmra.mxu2 %v1246_v22 }
  0x76   :  { %1374 = vmatmul.msk.bf16.gmra.mxu1 %vm443_vm0, %v1138_v25  ;;  %v1450_v25 = vld [vmem:[%s2357_s0 + $0x194] sm:$0xf0] }
  0x77   :  { %1391 = vmatmul.msk.bf16.gmra.mxu3 %vm443_vm0, %v1274_v30  ;;  %v1278_v30 = vor.u32 %v1450_v25, %v1277_v24  ;;  %v1457_v24 = vld [vmem:[%s2357_s0 + $0x1d4] sm:$0xf]  ;;  %v1311_v25 = vld [vmem:[%s2357_s0 + $0x1d8] sm:$0xf0] }
  0x81   :  { %578 = vmatmul.bf16.gmra.mxu0 %v1126_v33  ;;  %v1167_v33 = vld [vmem:[%s2357_s0 + $0xb8] sm:$0xf0] }
  0x82   :  { %658 = vmatmul.bf16.gmra.mxu2 %v1254_v34  ;;  %v1170_v36 = vor.u32 %v1421_v32, %v1167_v33  ;;  %v1454_v32 = vld [vmem:[%s2357_s0 + $0x1b4] sm:$0xf0] }
  0x83   :  { %v718_v38 = vpop.f32.mrf.mxu1 }
  0x86   :  { %1375 = vmatmul.msk.bf16.gmra.mxu1 %vm443_vm0, %v1146_v37 }
  0x87   :  { %1392 = vmatmul.msk.bf16.gmra.mxu3 %vm443_vm0, %v1282_v43 }
  0x8a   :  { %v1758_v51 = vpop.f32.mrf.mxu3 }
  0x8b   :  { %v720_v44 = vpop.f32.mrf.mxu1 }
  0x91   :  { %583 = vmatmul.bf16.gmra.mxu0 %v1134_v47  ;;  %v1455_v47 = vld [vmem:[%s2357_s0 + $0x1c4] sm:$0xf] }
  0x92   :  { %663 = vmatmul.bf16.gmra.mxu2 %v1262_v48  ;;  %v1761_v54 = vpop.f32.mrf.mxu3  ;;  %v1303_v48 = vld [vmem:[%s2357_s0 + $0x1c8] sm:$0xf0] }
  0x93   :  { %v723_v53 = vpop.f32.mrf.mxu1 }
  0x96   :  { %1376 = vmatmul.msk.bf16.gmra.mxu1 %vm443_vm0, %v1154_v52  ;;  %v1420_v52 = vld [vmem:[%s2357_s0 + $0xa4] sm:$0xf0] }
  0x97   :  { %1393 = vmatmul.msk.bf16.gmra.mxu3 %vm443_vm0, %v1290_v59  ;;  %v1158_v62 = vor.u32 %v1420_v52, %v1157_v50 }
  0x9a   :  { %v1796_v6 = vpop.f32.mrf.mxu3 }
  0x9b   :  { %v1775_v60 = vpop.f32.mrf.mxu1 }
  0x9e   :  { %v549_v1 = vpop.f32.mrf.mxu0 }
  0x9f   :  { %v550_v3 = vadd.f32 %v1780_v61, %v549_v1  ;;  %v1286_v1 = vor.u32 %v1452_v57, %v1285_v56 }
  0xa1   :  { %v719_v7 = vadd.f32 %v718_v38, %v550_v3  ;;  %588 = vmatmul.bf16.gmra.mxu0 %v1142_v0  ;;  %v1423_v3 = vld [vmem:[%s2357_s0 + $0xc4] sm:$0xf] }
  0xa2   :  { %668 = vmatmul.bf16.gmra.mxu2 %v1270_v2  ;;  %v1808_v15 = vpop.f32.mrf.mxu3 }
  0xa3   :  { %v878_v9 = vmax.f32 %v719_v7, 0.0  ;;  %v1798_v10 = vpop.f32.mrf.mxu1 }
  0xa5   :  { %v942_v11 = vpack.c.bf16 %v878_v9, %v878_v9  ;;  %v1800_v12 = vpop.f32.mrf.mxu2 }
  0xa6   :  { %1377 = vmatmul.msk.bf16.gmra.mxu1 %vm443_vm0, %v1162_v8  ;;  %v551_v13 = vpop.f32.mrf.mxu0 }
  0xa7   :  { %1007 = vst.msk [vmem:[%s2359_s3] sm:$0xf] %vm1006_vm1, %v942_v11  ;;  %v552_v14 = vadd.f32 %v1780_v61, %v551_v13  ;;  %1394 = vmatmul.msk.bf16.gmra.mxu3 %vm443_vm0, %v1298_v21  ;;  %v1178_v11 = vor.u32 %v1423_v3, %v1175_v4  ;;  %v1424_v3 = vld [vmem:[%s2357_s0 + $0xc4] sm:$0xf0] }
  0xa9   :  { %v721_v16 = vadd.f32 %v720_v44, %v552_v14 }
  0xaa   :  { %v1844_v34 = vpop.f32.mrf.mxu3 }
  0xab   :  { %v879_v22 = vmax.f32 %v721_v16, 0.0  ;;  %v1822_v23 = vpop.f32.mrf.mxu1 }
  0xad   :  { %v943_v26 = vpack.c.bf16 %v879_v22, %v879_v22  ;;  %v1831_v27 = vpop.f32.mrf.mxu2 }
  0xae   :  { %v554_v29 = vpop.f32.mrf.mxu0 }
  0xaf   :  { %1008 = vst.msk [vmem:[%s2359_s3 + $0x4] sm:$0xf] %vm1006_vm1, %v943_v26  ;;  %v555_v31 = vadd.f32 %v1780_v61, %v554_v29  ;;  %v1422_v29 = vld [vmem:[%s2357_s0 + $0xb4] sm:$0xf0] }
  0xb1   :  { %v724_v35 = vadd.f32 %v723_v53, %v555_v31  ;;  %593 = vmatmul.bf16.gmra.mxu0 %v1150_v28  ;;  %v1165_v28 = vld [vmem:[%s2357_s0 + $0xb0] sm:$0xf] }
  0xb2   :  { %673 = vmatmul.bf16.gmra.mxu2 %v1278_v30  ;;  %v1855_v44 = vpop.f32.mrf.mxu3  ;;  %v1293_v31 = vld [vmem:[%s2357_s0 + $0x1b0] sm:$0xf] }
  0xb3   :  { %v880_v37 = vmax.f32 %v724_v35, 0.0  ;;  %v1846_v38 = vpop.f32.mrf.mxu1 }
  0xb5   :  { %v944_v39 = vpack.c.bf16 %v880_v37, %v880_v37  ;;  %v634_v40 = vpop.f32.mrf.mxu2  ;;  %v1166_v37 = vor.u32 %v1422_v29, %v1165_v28 }
  0xb6   :  { %v635_v41 = vadd.f32 %v1780_v61, %v634_v40  ;;  %1378 = vmatmul.msk.bf16.gmra.mxu1 %vm443_vm0, %v1170_v36  ;;  %v556_v42 = vpop.f32.mrf.mxu0 }
  0xb7   :  { %1009 = vst.msk [vmem:[%s2359_s3 + $0x8] sm:$0xf] %vm1006_vm1, %v944_v39  ;;  %v557_v43 = vadd.f32 %v1780_v61, %v556_v42 }
  0xb8   :  { %v804_v45 = vadd.f32 %v1758_v51, %v635_v41  ;;  %v1306_v51 = vor.u32 %v1455_v47, %v1303_v48  ;;  %v1294_v41 = vor.u32 %v1454_v32, %v1293_v31 }
  0xb9   :  { %v726_v46 = vadd.f32 %v1775_v60, %v557_v43  ;;  %v1425_v43 = vld [vmem:[%s2357_s0 + $0xd4] sm:$0xf] }
  0xba   :  { %v912_v49 = vmax.f32 %v804_v45, 0.0  ;;  %1395 = vmatmul.msk.bf16.gmra.mxu3 %vm443_vm0, %v1306_v51  ;;  %v1896_v5 = vpop.f32.mrf.mxu3  ;;  %v1183_v45 = vld [vmem:[%s2357_s0 + $0xd8] sm:$0xf0] }
  0xbb   :  { %v881_v53 = vmax.f32 %v726_v46, 0.0  ;;  %v1871_v55 = vpop.f32.mrf.mxu1  ;;  %v1186_v50 = vor.u32 %v1425_v43, %v1183_v45  ;;  %v1309_v45 = vld [vmem:[%s2357_s0 + $0x1d0] sm:$0xf] }
  0xbc   :  { %v976_v58 = vpack.c.bf16 %v912_v49, %v912_v49 }
  0xbd   :  { %v945_v59 = vpack.c.bf16 %v881_v53, %v881_v53  ;;  %v636_v60 = vpop.f32.mrf.mxu2 }
  0xbe   :  { %1041 = vst.msk [vmem:[%s2359_s3 + $0x88] sm:$0xf] %vm1006_vm1, %v976_v58  ;;  %v637_v63 = vadd.f32 %v1780_v61, %v636_v60  ;;  %v559_v0 = vpop.f32.mrf.mxu0 }
  0xbf   :  { %1010 = vst.msk [vmem:[%s2359_s3 + $0xc] sm:$0xf] %vm1006_vm1, %v945_v59  ;;  %v560_v2 = vadd.f32 %v1780_v61, %v559_v0  ;;  %v1319_v0 = vld [vmem:[%s2357_s0 + $0x1e8] sm:$0xf0] }
  0xc0   :  { %v806_v7 = vadd.f32 %v1761_v54, %v637_v63  ;;  %v1459_v63 = vld [vmem:[%s2357_s0 + $0x1e4] sm:$0xf] }
  0xc1   :  { %v729_v8 = vadd.f32 %v1798_v10, %v560_v2  ;;  %598 = vmatmul.bf16.gmra.mxu0 %v1158_v62  ;;  %v1173_v2 = vld [vmem:[%s2357_s0 + $0xc0] sm:$0xf] }
  0xc2   :  { %v913_v9 = vmax.f32 %v806_v7, 0.0  ;;  %678 = vmatmul.bf16.gmra.mxu2 %v1286_v1  ;;  %v1913_v20 = vpop.f32.mrf.mxu3  ;;  %v1301_v7 = vld [vmem:[%s2357_s0 + $0x1c0] sm:$0xf] }
  0xc3   :  { %v882_v13 = vmax.f32 %v729_v8, 0.0  ;;  %v1900_v14 = vpop.f32.mrf.mxu1  ;;  %v1456_v8 = vld [vmem:[%s2357_s0 + $0x1c4] sm:$0xf0] }
  0xc4   :  { %v977_v16 = vpack.c.bf16 %v913_v9, %v913_v9 }
  0xc5   :  { %v946_v17 = vpack.c.bf16 %v882_v13, %v882_v13  ;;  %v639_v18 = vpop.f32.mrf.mxu2 }
  0xc6   :  { %1042 = vst.msk [vmem:[%s2359_s3 + $0x8c] sm:$0xf] %vm1006_vm1, %v977_v16  ;;  %v640_v19 = vadd.f32 %v1780_v61, %v639_v18  ;;  %1379 = vmatmul.msk.bf16.gmra.mxu1 %vm443_vm0, %v1178_v11  ;;  %v561_v54 = vpop.f32.mrf.mxu0  ;;  %v1174_v16 = vor.u32 %v1424_v3, %v1173_v2 }
  0xc7   :  { %1011 = vst.msk [vmem:[%s2359_s3 + $0x10] sm:$0xf] %vm1006_vm1, %v946_v17  ;;  %v562_v10 = vadd.f32 %v1780_v61, %v561_v54 }
  0xc8   :  { %v809_v21 = vadd.f32 %v1796_v6, %v640_v19  ;;  %v1314_v6 = vor.u32 %v1457_v24, %v1311_v25  ;;  %v1302_v19 = vor.u32 %v1456_v8, %v1301_v7 }
  0xc9   :  { %v731_v22 = vadd.f32 %v1822_v23, %v562_v10  ;;  %v1427_v10 = vld [vmem:[%s2357_s0 + $0xe4] sm:$0xf] }
  0xca   :  { %v914_v26 = vmax.f32 %v809_v21, 0.0  ;;  %1396 = vmatmul.msk.bf16.gmra.mxu3 %vm443_vm0, %v1314_v6  ;;  %v1954_v46 = vpop.f32.mrf.mxu3  ;;  %v1191_v21 = vld [vmem:[%s2357_s0 + $0xe8] sm:$0xf0] }
  0xcb   :  { %v883_v30 = vmax.f32 %v731_v22, 0.0  ;;  %v1929_v23 = vpop.f32.mrf.mxu1  ;;  %v1194_v28 = vor.u32 %v1427_v10, %v1191_v21  ;;  %v1317_v10 = vld [vmem:[%s2357_s0 + $0x1e0] sm:$0xf] }
  0xcc   :  { %v978_v33 = vpack.c.bf16 %v914_v26, %v914_v26 }
  0xcd   :  { %v947_v35 = vpack.c.bf16 %v883_v30, %v883_v30  ;;  %v641_v36 = vpop.f32.mrf.mxu2 }
  0xce   :  { %1043 = vst.msk [vmem:[%s2359_s3 + $0x90] sm:$0xf] %vm1006_vm1, %v978_v33  ;;  %v642_v39 = vadd.f32 %v1780_v61, %v641_v36  ;;  %v564_v40 = vpop.f32.mrf.mxu0 }
  0xcf   :  { %1012 = vst.msk [vmem:[%s2359_s3 + $0x14] sm:$0xf] %vm1006_vm1, %v947_v35  ;;  %v565_v42 = vadd.f32 %v1780_v61, %v564_v40 }
  0xd0   :  { %v811_v47 = vadd.f32 %v1808_v15, %v642_v39  ;;  %v1327_v39 = vld [vmem:[%s2357_s0 + $0x1f8] sm:$0xf0] }
  0xd1   :  { %v734_v48 = vadd.f32 %v1846_v38, %v565_v42  ;;  %603 = vmatmul.bf16.gmra.mxu0 %v1166_v37  ;;  %v1461_v37 = vld [vmem:[%s2357_s0 + $0x1f4] sm:$0xf]  ;;  %v1426_v42 = vld [vmem:[%s2357_s0 + $0xd4] sm:$0xf0] }
  0xd2   :  { %v915_v49 = vmax.f32 %v811_v47, 0.0  ;;  %683 = vmatmul.bf16.gmra.mxu2 %v1294_v41  ;;  %v1971_v59 = vpop.f32.mrf.mxu3  ;;  %v1181_v41 = vld [vmem:[%s2357_s0 + $0xd0] sm:$0xf]  ;;  %v1458_v47 = vld [vmem:[%s2357_s0 + $0x1d4] sm:$0xf0] }
  0xd3   :  { %v884_v52 = vmax.f32 %v734_v48, 0.0  ;;  %v1958_v51 = vpop.f32.mrf.mxu1 }
  0xd4   :  { %v979_v53 = vpack.c.bf16 %v915_v49, %v915_v49 }
  0xd5   :  { %v948_v56 = vpack.c.bf16 %v884_v52, %v884_v52  ;;  %v644_v57 = vpop.f32.mrf.mxu2 }
  0xd6   :  { %1044 = vst.msk [vmem:[%s2359_s3 + $0x94] sm:$0xf] %vm1006_vm1, %v979_v53  ;;  %v645_v58 = vadd.f32 %v1780_v61, %v644_v57  ;;  %1380 = vmatmul.msk.bf16.gmra.mxu1 %vm443_vm0, %v1186_v50  ;;  %v566_v15 = vpop.f32.mrf.mxu0  ;;  %v1182_v53 = vor.u32 %v1426_v42, %v1181_v41 }
  0xd7   :  { %1013 = vst.msk [vmem:[%s2359_s3 + $0x18] sm:$0xf] %vm1006_vm1, %v948_v56  ;;  %v567_v38 = vadd.f32 %v1780_v61, %v566_v15 }
  0xd8   :  { %v814_v60 = vadd.f32 %v1844_v34, %v645_v58  ;;  %v1322_v34 = vor.u32 %v1459_v63, %v1319_v0  ;;  %v1310_v58 = vor.u32 %v1458_v47, %v1309_v45 }
  0xd9   :  { %v736_v62 = vadd.f32 %v1871_v55, %v567_v38  ;;  %v1429_v38 = vld [vmem:[%s2357_s0 + $0xf4] sm:$0xf] }
  0xda   :  { %v916_v1 = vmax.f32 %v814_v60, 0.0  ;;  %1397 = vmatmul.msk.bf16.gmra.mxu3 %vm443_vm0, %v1322_v34  ;;  %v2014_v25 = vpop.f32.mrf.mxu3  ;;  %v1199_v60 = vld [vmem:[%s2357_s0 + $0xf8] sm:$0xf0] }
  0xdb   :  { %v885_v4 = vmax.f32 %v736_v62, 0.0  ;;  %v1987_v55 = vpop.f32.mrf.mxu1 }
  0xdc   :  { %v980_v9 = vpack.c.bf16 %v916_v1, %v916_v1  ;;  %v1202_v1 = vor.u32 %v1429_v38, %v1199_v60 }
  0xdd   :  { %v949_v11 = vpack.c.bf16 %v885_v4, %v885_v4  ;;  %v646_v13 = vpop.f32.mrf.mxu2 }
  0xde   :  { %1045 = vst.msk [vmem:[%s2359_s3 + $0x98] sm:$0xf] %vm1006_vm1, %v980_v9  ;;  %v647_v17 = vadd.f32 %v1780_v61, %v646_v13  ;;  %v569_v18 = vpop.f32.mrf.mxu0 }
  0xdf   :  { %1014 = vst.msk [vmem:[%s2359_s3 + $0x1c] sm:$0xf] %vm1006_vm1, %v949_v11  ;;  %v570_v54 = vadd.f32 %v1780_v61, %v569_v18  ;;  %v1428_v18 = vld [vmem:[%s2357_s0 + $0xe4] sm:$0xf0] }
  0xe0   :  { %v816_v22 = vadd.f32 %v1855_v44, %v647_v17  ;;  %v1189_v17 = vld [vmem:[%s2357_s0 + $0xe0] sm:$0xf] }
  0xe1   :  { %v739_v24 = vadd.f32 %v1900_v14, %v570_v54  ;;  %608 = vmatmul.bf16.gmra.mxu0 %v1174_v16 }
  0xe2   :  { %v917_v26 = vmax.f32 %v816_v22, 0.0  ;;  %688 = vmatmul.bf16.gmra.mxu2 %v1302_v19  ;;  %v2051_v48 = vpop.f32.mrf.mxu3 }
  0xe3   :  { %v886_v29 = vmax.f32 %v739_v24, 0.0  ;;  %v2016_v6 = vpop.f32.mrf.mxu1  ;;  %v1190_v24 = vor.u32 %v1428_v18, %v1189_v17 }
  0xe4   :  { %v981_v30 = vpack.c.bf16 %v917_v26, %v917_v26 }
  0xe5   :  { %v950_v31 = vpack.c.bf16 %v886_v29, %v886_v29  ;;  %v649_v32 = vpop.f32.mrf.mxu2 }
  0xe6   :  { %1046 = vst.msk [vmem:[%s2359_s3 + $0x9c] sm:$0xf] %vm1006_vm1, %v981_v30  ;;  %v650_v44 = vadd.f32 %v1780_v61, %v649_v32  ;;  %1381 = vmatmul.msk.bf16.gmra.mxu1 %vm443_vm0, %v1194_v28  ;;  %v571_v14 = vpop.f32.mrf.mxu0  ;;  %v1207_v32 = vld [vmem:[%s2357_s0 + $0x108] sm:$0xf0] }
  0xe7   :  { %1015 = vst.msk [vmem:[%s2359_s3 + $0x20] sm:$0xf] %vm1006_vm1, %v950_v31  ;;  %v572_v33 = vadd.f32 %v1780_v61, %v571_v14  ;;  %v1431_v31 = vld [vmem:[%s2357_s0 + $0x104] sm:$0xf] }
  0xe8   :  { %v819_v35 = vadd.f32 %v1896_v5, %v650_v44  ;;  %v1330_v5 = vor.u32 %v1461_v37, %v1327_v39 }
  0xe9   :  { %v741_v36 = vadd.f32 %v1929_v23, %v572_v33 }
  0xea   :  { %v918_v40 = vmax.f32 %v819_v35, 0.0  ;;  %1398 = vmatmul.msk.bf16.gmra.mxu3 %vm443_vm0, %v1330_v5  ;;  %v2074_v8 = vpop.f32.mrf.mxu3 }
  0xeb   :  { %v887_v43 = vmax.f32 %v741_v36, 0.0  ;;  %v2043_v23 = vpop.f32.mrf.mxu1  ;;  %v1210_v36 = vor.u32 %v1431_v31, %v1207_v32 }
  0xec   :  { %v982_v49 = vpack.c.bf16 %v918_v40, %v918_v40 }
  0xed   :  { %v951_v50 = vpack.c.bf16 %v887_v43, %v887_v43  ;;  %v651_v52 = vpop.f32.mrf.mxu2 }
  0xee   :  { %1047 = vst.msk [vmem:[%s2359_s3 + $0xa0] sm:$0xf] %vm1006_vm1, %v982_v49  ;;  %v652_v56 = vadd.f32 %v1780_v61, %v651_v52  ;;  %v574_v57 = vpop.f32.mrf.mxu0  ;;  %v1430_v52 = vld [vmem:[%s2357_s0 + $0xf4] sm:$0xf0] }
  0xef   :  { %1016 = vst.msk [vmem:[%s2359_s3 + $0x24] sm:$0xf] %vm1006_vm1, %v951_v50  ;;  %v575_v15 = vadd.f32 %v1780_v61, %v574_v57  ;;  %v1197_v50 = vld [vmem:[%s2357_s0 + $0xf0] sm:$0xf] }
  0xf0   :  { %v821_v62 = vadd.f32 %v1913_v20, %v652_v56  ;;  %v1325_v57 = vld [vmem:[%s2357_s0 + $0x1f0] sm:$0xf]  ;;  %v1198_v38 = vor.u32 %v1430_v52, %v1197_v50 }
  0xf1   :  { %v744_v63 = vadd.f32 %v1958_v51, %v575_v15  ;;  %613 = vmatmul.bf16.gmra.mxu0 %v1182_v53 }
  0xf2   :  { %v919_v0 = vmax.f32 %v821_v62, 0.0  ;;  %693 = vmatmul.bf16.gmra.mxu2 %v1310_v58  ;;  %v2119_v44 = vpop.f32.mrf.mxu3 }
  0xf3   :  { %v888_v2 = vmax.f32 %v744_v63, 0.0  ;;  %v2072_v3 = vpop.f32.mrf.mxu1 }
  0xf4   :  { %v983_v34 = vpack.c.bf16 %v919_v0, %v919_v0 }
  0xf5   :  { %v952_v4 = vpack.c.bf16 %v888_v2, %v888_v2  ;;  %v654_v7 = vpop.f32.mrf.mxu2 }
  0xf6   :  { %1048 = vst.msk [vmem:[%s2359_s3 + $0xa4] sm:$0xf] %vm1006_vm1, %v983_v34  ;;  %v655_v20 = vadd.f32 %v1780_v61, %v654_v7  ;;  %1382 = vmatmul.msk.bf16.gmra.mxu1 %vm443_vm0, %v1202_v1  ;;  %v576_v51 = vpop.f32.mrf.mxu0 }
  0xf7   :  { %1017 = vst.msk [vmem:[%s2359_s3 + $0x28] sm:$0xf] %vm1006_vm1, %v952_v4  ;;  %v577_v9 = vadd.f32 %v1780_v61, %v576_v51 }
  0xf8   :  { %v824_v11 = vadd.f32 %v1954_v46, %v655_v20  ;;  %v1460_v46 = vld [vmem:[%s2357_s0 + $0x1e4] sm:$0xf0] }
  0xf9   :  { %v746_v13 = vadd.f32 %v1987_v55, %v577_v9  ;;  %v1318_v29 = vor.u32 %v1460_v46, %v1317_v10 }
  0xfa   :  { %v920_v16 = vmax.f32 %v824_v11, 0.0  ;;  %v838_v47 = vpop.f32.mrf.mxu3 }
  0xfb   :  { %v889_v19 = vmax.f32 %v746_v13, 0.0  ;;  %v2095_v54 = vpop.f32.mrf.mxu1 }
  0xfc   :  { %v984_v55 = vpack.c.bf16 %v920_v16, %v920_v16 }
  0xfd   :  { %v953_v21 = vpack.c.bf16 %v889_v19, %v889_v19  ;;  %v656_v22 = vpop.f32.mrf.mxu2 }
  0xfe   :  { %1049 = vst.msk [vmem:[%s2359_s3 + $0xa8] sm:$0xf] %vm1006_vm1, %v984_v55  ;;  %v657_v26 = vadd.f32 %v1780_v61, %v656_v22  ;;  %v579_v28 = vpop.f32.mrf.mxu0 }
  0xff   :  { %1018 = vst.msk [vmem:[%s2359_s3 + $0x2c] sm:$0xf] %vm1006_vm1, %v953_v21  ;;  %v580_v30 = vadd.f32 %v1780_v61, %v579_v28 }
 0x100   :  { %v826_v14 = vadd.f32 %v1971_v59, %v657_v26 }
 0x101   :  { %v749_v33 = vadd.f32 %v2016_v6, %v580_v30  ;;  %618 = vmatmul.bf16.gmra.mxu0 %v1190_v24 }
 0x102   :  { %v921_v35 = vmax.f32 %v826_v14, 0.0  ;;  %698 = vmatmul.bf16.gmra.mxu2 %v1318_v29  ;;  %v840_v20 = vpop.f32.mrf.mxu3 }
 0x103   :  { %v890_v37 = vmax.f32 %v749_v33, 0.0  ;;  %v758_v39 = vpop.f32.mrf.mxu1 }
 0x104   :  { %v985_v40 = vpack.c.bf16 %v921_v35, %v921_v35 }
 0x105   :  { %v954_v41 = vpack.c.bf16 %v890_v37, %v890_v37  ;;  %v659_v42 = vpop.f32.mrf.mxu2 }
 0x106   :  { %1050 = vst.msk [vmem:[%s2359_s3 + $0xac] sm:$0xf] %vm1006_vm1, %v985_v40  ;;  %v660_v5 = vadd.f32 %v1780_v61, %v659_v42  ;;  %1383 = vmatmul.msk.bf16.gmra.mxu1 %vm443_vm0, %v1210_v36  ;;  %v581_v59 = vpop.f32.mrf.mxu0 }
 0x107   :  { %1019 = vst.msk [vmem:[%s2359_s3 + $0x30] sm:$0xf] %vm1006_vm1, %v954_v41  ;;  %v582_v6 = vadd.f32 %v1780_v61, %v581_v59 }
 0x108   :  { %v829_v43 = vadd.f32 %v2014_v25, %v660_v5  ;;  %v1462_v25 = vld [vmem:[%s2357_s0 + $0x1f4] sm:$0xf0] }
 0x109   :  { %v751_v45 = vadd.f32 %v2043_v23, %v582_v6  ;;  %v1326_v63 = vor.u32 %v1462_v25, %v1325_v57 }
 0x10a   :  { %v922_v49 = vmax.f32 %v829_v43, 0.0  ;;  %v843_v22 = vpop.f32.mrf.mxu3 }
 0x10b   :  { %v891_v53 = vmax.f32 %v751_v45, 0.0  ;;  %v760_v56 = vpop.f32.mrf.mxu1 }
 0x10c   :  { %v986_v23 = vpack.c.bf16 %v922_v49, %v922_v49 }
 0x10d   :  { %v955_v58 = vpack.c.bf16 %v891_v53, %v891_v53  ;;  %v661_v15 = vpop.f32.mrf.mxu2 }
 0x10e   :  { %1051 = vst.msk [vmem:[%s2359_s3 + $0xb0] sm:$0xf] %vm1006_vm1, %v986_v23  ;;  %v662_v60 = vadd.f32 %v1780_v61, %v661_v15  ;;  %v584_v62 = vpop.f32.mrf.mxu0 }
 0x10f   :  { %1020 = vst.msk [vmem:[%s2359_s3 + $0x34] sm:$0xf] %vm1006_vm1, %v955_v58  ;;  %v585_v0 = vadd.f32 %v1780_v61, %v584_v62 }
 0x110   :  { %v831_v1 = vadd.f32 %v2051_v48, %v662_v60 }
 0x111   :  { %v754_v2 = vadd.f32 %v2072_v3, %v585_v0  ;;  %623 = vmatmul.bf16.gmra.mxu0 %v1198_v38 }
 0x112   :  { %v923_v34 = vmax.f32 %v831_v1, 0.0  ;;  %703 = vmatmul.bf16.gmra.mxu2 %v1326_v63  ;;  %v845_v37 = vpop.f32.mrf.mxu3 }
 0x113   :  { %v892_v4 = vmax.f32 %v754_v2, 0.0  ;;  %v763_v7 = vpop.f32.mrf.mxu1 }
 0x114   :  { %v987_v51 = vpack.c.bf16 %v923_v34, %v923_v34 }
 0x115   :  { %v956_v9 = vpack.c.bf16 %v892_v4, %v892_v4  ;;  %v664_v11 = vpop.f32.mrf.mxu2 }
 0x116   :  { %1052 = vst.msk [vmem:[%s2359_s3 + $0xb4] sm:$0xf] %vm1006_vm1, %v987_v51  ;;  %v665_v13 = vadd.f32 %v1780_v61, %v664_v11  ;;  %v586_v16 = vpop.f32.mrf.mxu0 }
 0x117   :  { %1021 = vst.msk [vmem:[%s2359_s3 + $0x38] sm:$0xf] %vm1006_vm1, %v956_v9  ;;  %v587_v48 = vadd.f32 %v1780_v61, %v586_v16 }
 0x118   :  { %v834_v3 = vadd.f32 %v2074_v8, %v665_v13 }
 0x119   :  { %v756_v17 = vadd.f32 %v2095_v54, %v587_v48 }
 0x11a   :  { %v924_v18 = vmax.f32 %v834_v3, 0.0  ;;  %v848_v53 = vpop.f32.mrf.mxu3 }
 0x11b   :  { %v893_v19 = vmax.f32 %v756_v17, 0.0  ;;  %v765_v10 = vpop.f32.mrf.mxu1 }
 0x11c   :  { %v988_v46 = vpack.c.bf16 %v924_v18, %v924_v18 }
 0x11d   :  { %v957_v55 = vpack.c.bf16 %v893_v19, %v893_v19  ;;  %v666_v21 = vpop.f32.mrf.mxu2 }
 0x11e   :  { %1053 = vst.msk [vmem:[%s2359_s3 + $0xb8] sm:$0xf] %vm1006_vm1, %v988_v46  ;;  %v667_v24 = vadd.f32 %v1780_v61, %v666_v21  ;;  %v589_v26 = vpop.f32.mrf.mxu0 }
 0x11f   :  { %1022 = vst.msk [vmem:[%s2359_s3 + $0x3c] sm:$0xf] %vm1006_vm1, %v957_v55  ;;  %v590_v8 = vadd.f32 %v1780_v61, %v589_v26 }
 0x120   :  { %v836_v54 = vadd.f32 %v2119_v44, %v667_v24 }
 0x121   :  { %v759_v28 = vadd.f32 %v758_v39, %v590_v8 }
 0x122   :  { %v925_v29 = vmax.f32 %v836_v54, 0.0  ;;  %v850_v4 = vpop.f32.mrf.mxu3 }
 0x123   :  { %v894_v30 = vmax.f32 %v759_v28, 0.0  ;;  %v768_v31 = vpop.f32.mrf.mxu1 }
 0x124   :  { %v989_v32 = vpack.c.bf16 %v925_v29, %v925_v29 }
 0x125   :  { %v958_v14 = vpack.c.bf16 %v894_v30, %v894_v30  ;;  %v669_v33 = vpop.f32.mrf.mxu2 }
 0x126   :  { %1054 = vst.msk [vmem:[%s2359_s3 + $0xbc] sm:$0xf] %vm1006_vm1, %v989_v32  ;;  %v670_v35 = vadd.f32 %v1780_v61, %v669_v33  ;;  %v591_v36 = vpop.f32.mrf.mxu0 }
 0x127   :  { %1023 = vst.msk [vmem:[%s2359_s3 + $0x40] sm:$0xf] %vm1006_vm1, %v958_v14  ;;  %v592_v44 = vadd.f32 %v1780_v61, %v591_v36 }
 0x128   :  { %v839_v39 = vadd.f32 %v838_v47, %v670_v35 }
 0x129   :  { %v761_v40 = vadd.f32 %v760_v56, %v592_v44 }
 0x12a   :  { %v926_v41 = vmax.f32 %v839_v39, 0.0  ;;  %v853_v55 = vpop.f32.mrf.mxu3 }
 0x12b   :  { %v895_v42 = vmax.f32 %v761_v40, 0.0  ;;  %v770_v5 = vpop.f32.mrf.mxu1 }
 0x12c   :  { %v990_v59 = vpack.c.bf16 %v926_v41, %v926_v41 }
 0x12d   :  { %v959_v6 = vpack.c.bf16 %v895_v42, %v895_v42  ;;  %v671_v43 = vpop.f32.mrf.mxu2 }
 0x12e   :  { %1055 = vst.msk [vmem:[%s2359_s3 + $0xc0] sm:$0xf] %vm1006_vm1, %v990_v59  ;;  %v672_v45 = vadd.f32 %v1780_v61, %v671_v43  ;;  %v594_v49 = vpop.f32.mrf.mxu0 }
 0x12f   :  { %1024 = vst.msk [vmem:[%s2359_s3 + $0x44] sm:$0xf] %vm1006_vm1, %v959_v6  ;;  %v595_v47 = vadd.f32 %v1780_v61, %v594_v49 }
 0x130   :  { %v841_v50 = vadd.f32 %v840_v20, %v672_v45 }
 0x131   :  { %v764_v52 = vadd.f32 %v763_v7, %v595_v47 }
 0x132   :  { %v927_v56 = vmax.f32 %v841_v50, 0.0  ;;  %v855_v36 = vpop.f32.mrf.mxu3 }
 0x133   :  { %v896_v57 = vmax.f32 %v764_v52, 0.0  ;;  %v773_v25 = vpop.f32.mrf.mxu1 }
 0x134   :  { %v991_v23 = vpack.c.bf16 %v927_v56, %v927_v56 }
 0x135   :  { %v960_v58 = vpack.c.bf16 %v896_v57, %v896_v57  ;;  %v674_v15 = vpop.f32.mrf.mxu2 }
 0x136   :  { %1056 = vst.msk [vmem:[%s2359_s3 + $0xc4] sm:$0xf] %vm1006_vm1, %v991_v23  ;;  %v675_v38 = vadd.f32 %v1780_v61, %v674_v15  ;;  %v596_v60 = vpop.f32.mrf.mxu0 }
 0x137   :  { %1025 = vst.msk [vmem:[%s2359_s3 + $0x48] sm:$0xf] %vm1006_vm1, %v960_v58  ;;  %v597_v62 = vadd.f32 %v1780_v61, %v596_v60 }
 0x138   :  { %v844_v63 = vadd.f32 %v843_v22, %v675_v38 }
 0x139   :  { %v766_v0 = vadd.f32 %v765_v10, %v597_v62 }
 0x13a   :  { %v928_v1 = vmax.f32 %v844_v63, 0.0 }
 0x13b   :  { %v897_v2 = vmax.f32 %v766_v0, 0.0  ;;  %v775_v34 = vpop.f32.mrf.mxu1 }
 0x13c   :  { %v992_v7 = vpack.c.bf16 %v928_v1, %v928_v1 }
 0x13d   :  { %v961_v20 = vpack.c.bf16 %v897_v2, %v897_v2  ;;  %v676_v51 = vpop.f32.mrf.mxu2  ;;  %v858_v50 = vpop.f32.mrf.mxu3 }
 0x13e   :  { %1057 = vst.msk [vmem:[%s2359_s3 + $0xc8] sm:$0xf] %vm1006_vm1, %v992_v7  ;;  %v677_v9 = vadd.f32 %v1780_v61, %v676_v51  ;;  %v599_v11 = vpop.f32.mrf.mxu0 }
 0x13f   :  { %1026 = vst.msk [vmem:[%s2359_s3 + $0x4c] sm:$0xf] %vm1006_vm1, %v961_v20  ;;  %v600_v13 = vadd.f32 %v1780_v61, %v599_v11 }
 0x140   :  { %v846_v16 = vadd.f32 %v845_v37, %v677_v9 }
 0x141   :  { %v769_v48 = vadd.f32 %v768_v31, %v600_v13 }
 0x142   :  { %v929_v3 = vmax.f32 %v846_v16, 0.0 }
 0x143   :  { %v898_v17 = vmax.f32 %v769_v48, 0.0  ;;  %v778_v18 = vpop.f32.mrf.mxu1 }
 0x144   :  { %v993_v19 = vpack.c.bf16 %v929_v3, %v929_v3 }
 0x145   :  { %v962_v10 = vpack.c.bf16 %v898_v17, %v898_v17  ;;  %v679_v46 = vpop.f32.mrf.mxu2  ;;  %v860_v2 = vpop.f32.mrf.mxu3 }
 0x146   :  { %1058 = vst.msk [vmem:[%s2359_s3 + $0xcc] sm:$0xf] %vm1006_vm1, %v993_v19  ;;  %v680_v21 = vadd.f32 %v1780_v61, %v679_v46  ;;  %v601_v22 = vpop.f32.mrf.mxu0 }
 0x147   :  { %1027 = vst.msk [vmem:[%s2359_s3 + $0x50] sm:$0xf] %vm1006_vm1, %v962_v10  ;;  %v602_v24 = vadd.f32 %v1780_v61, %v601_v22 }
 0x148   :  { %v849_v26 = vadd.f32 %v848_v53, %v680_v21 }
 0x149   :  { %v771_v8 = vadd.f32 %v770_v5, %v602_v24 }
 0x14a   :  { %v930_v54 = vmax.f32 %v849_v26, 0.0 }
 0x14b   :  { %v899_v28 = vmax.f32 %v771_v8, 0.0  ;;  %v780_v29 = vpop.f32.mrf.mxu1 }
 0x14c   :  { %v994_v30 = vpack.c.bf16 %v930_v54, %v930_v54 }
 0x14d   :  { %v963_v31 = vpack.c.bf16 %v899_v28, %v899_v28  ;;  %v681_v32 = vpop.f32.mrf.mxu2  ;;  %v863_v10 = vpop.f32.mrf.mxu3 }
 0x14e   :  { %1059 = vst.msk [vmem:[%s2359_s3 + $0xd0] sm:$0xf] %vm1006_vm1, %v994_v30  ;;  %v682_v14 = vadd.f32 %v1780_v61, %v681_v32  ;;  %v604_v33 = vpop.f32.mrf.mxu0 }
 0x14f   :  { %1028 = vst.msk [vmem:[%s2359_s3 + $0x54] sm:$0xf] %vm1006_vm1, %v963_v31  ;;  %v605_v35 = vadd.f32 %v1780_v61, %v604_v33 }
 0x150   :  { %v851_v44 = vadd.f32 %v850_v4, %v682_v14 }
 0x151   :  { %v774_v37 = vadd.f32 %v773_v25, %v605_v35 }
 0x152   :  { %v931_v39 = vmax.f32 %v851_v44, 0.0 }
 0x153   :  { %v900_v40 = vmax.f32 %v774_v37, 0.0  ;;  %v783_v41 = vpop.f32.mrf.mxu1 }
 0x154   :  { %v995_v42 = vpack.c.bf16 %v931_v39, %v931_v39 }
 0x155   :  { %v964_v5 = vpack.c.bf16 %v900_v40, %v900_v40  ;;  %v684_v59 = vpop.f32.mrf.mxu2  ;;  %v865_v33 = vpop.f32.mrf.mxu3 }
 0x156   :  { %1060 = vst.msk [vmem:[%s2359_s3 + $0xd4] sm:$0xf] %vm1006_vm1, %v995_v42  ;;  %v685_v6 = vadd.f32 %v1780_v61, %v684_v59  ;;  %v606_v43 = vpop.f32.mrf.mxu0 }
 0x157   :  { %1029 = vst.msk [vmem:[%s2359_s3 + $0x58] sm:$0xf] %vm1006_vm1, %v964_v5  ;;  %v607_v45 = vadd.f32 %v1780_v61, %v606_v43 }
 0x158   :  { %v854_v49 = vadd.f32 %v853_v55, %v685_v6 }
 0x159   :  { %v776_v47 = vadd.f32 %v775_v34, %v607_v45 }
 0x15a   :  { %v932_v52 = vmax.f32 %v854_v49, 0.0 }
 0x15b   :  { %v901_v53 = vmax.f32 %v776_v47, 0.0  ;;  %v785_v56 = vpop.f32.mrf.mxu1  ;;  %v630_v47 = vadd.f32 %v1780_v61, %v1800_v12 }
 0x15c   :  { %v996_v57 = vpack.c.bf16 %v932_v52, %v932_v52 }
 0x15d   :  { %v965_v25 = vpack.c.bf16 %v901_v53, %v901_v53  ;;  %v686_v23 = vpop.f32.mrf.mxu2  ;;  %v868_v49 = vpop.f32.mrf.mxu3 }
 0x15e   :  { %1061 = vst.msk [vmem:[%s2359_s3 + $0xd8] sm:$0xf] %vm1006_vm1, %v996_v57  ;;  %v687_v58 = vadd.f32 %v1780_v61, %v686_v23  ;;  %v609_v15 = vpop.f32.mrf.mxu0 }
 0x15f   :  { %1030 = vst.msk [vmem:[%s2359_s3 + $0x5c] sm:$0xf] %vm1006_vm1, %v965_v25  ;;  %v610_v38 = vadd.f32 %v1780_v61, %v609_v15 }
 0x160   :  { %v856_v60 = vadd.f32 %v855_v36, %v687_v58 }
 0x161   :  { %v779_v62 = vadd.f32 %v778_v18, %v610_v38 }
 0x162   :  { %v933_v63 = vmax.f32 %v856_v60, 0.0 }
 0x163   :  { %v902_v0 = vmax.f32 %v779_v62, 0.0  ;;  %v788_v1 = vpop.f32.mrf.mxu1 }
 0x164   :  { %v997_v34 = vpack.c.bf16 %v933_v63, %v933_v63 }
 0x165   :  { %v966_v4 = vpack.c.bf16 %v902_v0, %v902_v0  ;;  %v689_v7 = vpop.f32.mrf.mxu2  ;;  %v632_v0 = vadd.f32 %v1780_v61, %v1831_v27 }
 0x166   :  { %1062 = vst.msk [vmem:[%s2359_s3 + $0xdc] sm:$0xf] %vm1006_vm1, %v997_v34  ;;  %v690_v20 = vadd.f32 %v1780_v61, %v689_v7  ;;  %v611_v51 = vpop.f32.mrf.mxu0  ;;  %v870_v34 = vpop.f32.mrf.mxu3 }
 0x167   :  { %1031 = vst.msk [vmem:[%s2359_s3 + $0x60] sm:$0xf] %vm1006_vm1, %v966_v4  ;;  %v612_v9 = vadd.f32 %v1780_v61, %v611_v51 }
 0x168   :  { %v859_v11 = vadd.f32 %v858_v50, %v690_v20 }
 0x169   :  { %v781_v13 = vadd.f32 %v780_v29, %v612_v9 }
 0x16a   :  { %v934_v16 = vmax.f32 %v859_v11, 0.0 }
 0x16b   :  { %v903_v48 = vmax.f32 %v781_v13, 0.0  ;;  %v790_v3 = vpop.f32.mrf.mxu1 }
 0x16c   :  { %v998_v17 = vpack.c.bf16 %v934_v16, %v934_v16 }
 0x16d   :  { %v967_v18 = vpack.c.bf16 %v903_v48, %v903_v48  ;;  %v691_v19 = vpop.f32.mrf.mxu2 }
 0x16e   :  { %1063 = vst.msk [vmem:[%s2359_s3 + $0xe0] sm:$0xf] %vm1006_vm1, %v998_v17  ;;  %v692_v46 = vadd.f32 %v1780_v61, %v691_v19  ;;  %v614_v55 = vpop.f32.mrf.mxu0 }
 0x16f   :  { %1032 = vst.msk [vmem:[%s2359_s3 + $0x64] sm:$0xf] %vm1006_vm1, %v967_v18  ;;  %v615_v21 = vadd.f32 %v1780_v61, %v614_v55  ;;  %v873_v55 = vpop.f32.mrf.mxu3 }
 0x170   :  { %v861_v22 = vadd.f32 %v860_v2, %v692_v46 }
 0x171   :  { %v784_v24 = vadd.f32 %v783_v41, %v615_v21 }
 0x172   :  { %v935_v26 = vmax.f32 %v861_v22, 0.0 }
 0x173   :  { %v904_v8 = vmax.f32 %v784_v24, 0.0  ;;  %v793_v54 = vpop.f32.mrf.mxu1 }
 0x174   :  { %v999_v28 = vpack.c.bf16 %v935_v26, %v935_v26 }
 0x175   :  { %v968_v29 = vpack.c.bf16 %v904_v8, %v904_v8  ;;  %v694_v30 = vpop.f32.mrf.mxu2 }
 0x176   :  { %1064 = vst.msk [vmem:[%s2359_s3 + $0xe4] sm:$0xf] %vm1006_vm1, %v999_v28  ;;  %v695_v31 = vadd.f32 %v1780_v61, %v694_v30  ;;  %v616_v32 = vpop.f32.mrf.mxu0 }
 0x177   :  { %1033 = vst.msk [vmem:[%s2359_s3 + $0x68] sm:$0xf] %vm1006_vm1, %v968_v29  ;;  %v617_v14 = vadd.f32 %v1780_v61, %v616_v32 }
 0x178   :  { %v864_v35 = vadd.f32 %v863_v10, %v695_v31 }
 0x179   :  { %v786_v36 = vadd.f32 %v785_v56, %v617_v14 }
 0x17a   :  { %v936_v44 = vmax.f32 %v864_v35, 0.0 }
 0x17b   :  { %v905_v37 = vmax.f32 %v786_v36, 0.0  ;;  %v795_v39 = vpop.f32.mrf.mxu1 }
 0x17c   :  { %v1000_v40 = vpack.c.bf16 %v936_v44, %v936_v44 }
 0x17d   :  { %v969_v41 = vpack.c.bf16 %v905_v37, %v905_v37  ;;  %v696_v42 = vpop.f32.mrf.mxu2 }
 0x17e   :  { %1065 = vst.msk [vmem:[%s2359_s3 + $0xe8] sm:$0xf] %vm1006_vm1, %v1000_v40  ;;  %v697_v5 = vadd.f32 %v1780_v61, %v696_v42  ;;  %v619_v59 = vpop.f32.mrf.mxu0 }
 0x17f   :  { %1034 = vst.msk [vmem:[%s2359_s3 + $0x6c] sm:$0xf] %vm1006_vm1, %v969_v41  ;;  %v620_v6 = vadd.f32 %v1780_v61, %v619_v59 }
 0x180   :  { %v866_v43 = vadd.f32 %v865_v33, %v697_v5  ;;  %v875_v33 = vpop.f32.mrf.mxu3 }
 0x181   :  { %v789_v45 = vadd.f32 %v788_v1, %v620_v6 }
 0x182   :  { %v937_v50 = vmax.f32 %v866_v43, 0.0 }
 0x183   :  { %v906_v52 = vmax.f32 %v789_v45, 0.0  ;;  %v798_v53 = vpop.f32.mrf.mxu1 }
 0x184   :  { %v1001_v56 = vpack.c.bf16 %v937_v50, %v937_v50  ;;  %v799_v57 = vadd.f32 %v798_v53, %v630_v47 }
 0x185   :  { %v970_v25 = vpack.c.bf16 %v906_v52, %v906_v52  ;;  %v699_v23 = vpop.f32.mrf.mxu2 }
 0x186   :  { %1066 = vst.msk [vmem:[%s2359_s3 + $0xec] sm:$0xf] %vm1006_vm1, %v1001_v56  ;;  %v910_v58 = vmax.f32 %v799_v57, 0.0  ;;  %v700_v15 = vadd.f32 %v1780_v61, %v699_v23  ;;  %v621_v38 = vpop.f32.mrf.mxu0 }
 0x187   :  { %1035 = vst.msk [vmem:[%s2359_s3 + $0x70] sm:$0xf] %vm1006_vm1, %v970_v25  ;;  %v622_v12 = vadd.f32 %v1780_v61, %v621_v38  ;;  %v1482_v61 = vld [vmem:[%s2358_s2] ss:$0 sm:$0xff] }
 0x188   :  { %v974_v60 = vpack.c.bf16 %v910_v58, %v910_v58  ;;  %v869_v62 = vadd.f32 %v868_v49, %v700_v15 }
 0x189   :  { %v791_v63 = vadd.f32 %v790_v3, %v622_v12 }
 0x18a   :  { %1039 = vst.msk [vmem:[%s2359_s3 + $0x80] sm:$0xf] %vm1006_vm1, %v974_v60  ;;  %v938_v1 = vmax.f32 %v869_v62, 0.0 }
 0x18b   :  { %v907_v2 = vmax.f32 %v791_v63, 0.0  ;;  %v800_v4 = vpop.f32.mrf.mxu1 }
 0x18c   :  { %v1002_v7 = vpack.c.bf16 %v938_v1, %v938_v1  ;;  %v801_v20 = vadd.f32 %v800_v4, %v632_v0 }
 0x18d   :  { %v971_v51 = vpack.c.bf16 %v907_v2, %v907_v2  ;;  %v701_v9 = vpop.f32.mrf.mxu2 }
 0x18e   :  { %1067 = vst.msk [vmem:[%s2359_s3 + $0xf0] sm:$0xf] %vm1006_vm1, %v1002_v7  ;;  %v911_v11 = vmax.f32 %v801_v20, 0.0  ;;  %v702_v27 = vadd.f32 %v1482_v61, %v701_v9  ;;  %v624_v13 = vpop.f32.mrf.mxu0 }
 0x18f   :  { %1036 = vst.msk [vmem:[%s2359_s3 + $0x74] sm:$0xf] %vm1006_vm1, %v971_v51  ;;  %v625_v16 = vadd.f32 %v1482_v61, %v624_v13 }
 0x190   :  { %v975_v48 = vpack.c.bf16 %v911_v11, %v911_v11  ;;  %v871_v3 = vadd.f32 %v870_v34, %v702_v27 }
 0x191   :  { %v794_v17 = vadd.f32 %v793_v54, %v625_v16 }
 0x192   :  { %1040 = vst.msk [vmem:[%s2359_s3 + $0x84] sm:$0xf] %vm1006_vm1, %v975_v48  ;;  %v939_v18 = vmax.f32 %v871_v3, 0.0 }
 0x193   :  { %v908_v19 = vmax.f32 %v794_v17, 0.0 }
 0x194   :  { %v1003_v10 = vpack.c.bf16 %v939_v18, %v939_v18 }
 0x195   :  { %v972_v46 = vpack.c.bf16 %v908_v19, %v908_v19  ;;  %v704_v21 = vpop.f32.mrf.mxu2 }
 0x196   :  { %1068 = vst.msk [vmem:[%s2359_s3 + $0xf4] sm:$0xf] %vm1006_vm1, %v1003_v10  ;;  %v705_v22 = vadd.f32 %v1482_v61, %v704_v21  ;;  %v626_v24 = vpop.f32.mrf.mxu0 }
 0x197   :  { %1037 = vst.msk [vmem:[%s2359_s3 + $0x78] sm:$0xf] %vm1006_vm1, %v972_v46  ;;  %v627_v26 = vadd.f32 %v1482_v61, %v626_v24 }
 0x198   :  { %v874_v8 = vadd.f32 %v873_v55, %v705_v22 }
 0x199   :  { %v796_v54 = vadd.f32 %v795_v39, %v627_v26 }
 0x19a   :  { %v940_v28 = vmax.f32 %v874_v8, 0.0 }
 0x19b   :  { %v909_v29 = vmax.f32 %v796_v54, 0.0 }
 0x19c   :  { %v1004_v30 = vpack.c.bf16 %v940_v28, %v940_v28 }
 0x19d   :  { %v973_v31 = vpack.c.bf16 %v909_v29, %v909_v29  ;;  %v706_v32 = vpop.f32.mrf.mxu2 }
 0x19e   :  { %1069 = vst.msk [vmem:[%s2359_s3 + $0xf8] sm:$0xf] %vm1006_vm1, %v1004_v30  ;;  %v707_v14 = vadd.f32 %v1482_v61, %v706_v32 }
 0x19f   :  { %1038 = vst.msk [vmem:[%s2359_s3 + $0x7c] sm:$0xf] %vm1006_vm1, %v973_v31 }
 0x1a0   :  { %v876_v35 = vadd.f32 %v875_v33, %v707_v14 }
 0x1a2   :  { %v941_v36 = vmax.f32 %v876_v35, 0.0 }
 0x1a4   :  { %v1005_v44 = vpack.c.bf16 %v941_v36, %v941_v36 }
 0x1a6   :  { %1070 = vst.msk [vmem:[%s2359_s3 + $0xfc] sm:$0xf] %vm1006_vm1, %v1005_v44 }

// kernel: basic_block_forward.5
= control target key start
LH: loop header
LB: loop body
LE: loop exit
PB: predicated region body
PF: predicated region fallthrough
CT: control target
= control target key end

     0   :  { %s799_s12 = smov 0   ;;  %s801_s13 = smov 0   ;;  %s930_s0 = inlined_call_operand.vmem [shape: bf16[2,4,64,36], index: 0, kind: input, shape index: {}]   ;;  %s931_s1 = inlined_call_operand.vmem [shape: bf16[3,36,16], index: 1, kind: input, shape index: {}]   ;;  %s932_s2 = inlined_call_operand.vmem [shape: f32[1,16], index: 2, kind: input, shape index: {}]   ;;  %s933_s3 = inlined_call_operand.vmem [shape: bf16[2,4,64,16], index: 3, kind: output, shape index: {}]  }
   0x1   :  { %s803_s14 = smov 0   ;;  %s805_s15 = smov 0  }
   0x2   :  { %s807_s16 = smov 0   ;;  %s809_s17 = smov 0  }
   0x3   :  { %s811_s18 = smov 0  }
   0x4 LB: > { %s25_s19 = sadd.s32 1, %s764_s15  ;;  %s28_s20 = sadd.s32 1, %s768_s16  ;;  %s776_s18 = sphi %s811_s18, %s13_s18   ;;  %s772_s17 = sphi %s809_s17, %s941_s17   ;;  %s768_s16 = sphi %s807_s16, %s940_s16   ;;  %s764_s15 = sphi %s805_s15, %s939_s15   ;;  %s760_s14 = sphi %s803_s14, %s938_s14   ;;  %s756_s13 = sphi %s801_s13, %s937_s13   ;;  %s752_s12 = sphi %s799_s12, %s936_s12  }
   0x5   : > { %p26_p0 = scmp.ge.s32.totalorder %s25_s19, 3  ;;  %p595_p1 = scmp.ge.s32.totalorder %s776_s18, 1 }
   0x6   : > { %p198_p2 = scmp.lt.s32.totalorder %s776_s18, 25  ;;  %s32_s21 = sadd.s32 1, %s772_s17 }
   0x7   : > { %s943_s19 = smov (%p26_p0, %s25_s19), 0  ;;  %s945_s20 = smov (!%p26_p0, %s28_s20), %s768_s16 }
   0x8   : > { %p199_p3 = pnand %p595_p1, %p198_p2  ;;  %p30_p4 = scmp.ge.s32.totalorder %s945_s20, 4 }
   0x9   : > { %s241_s22 = sadd.s32 (!%p199_p3), %s752_s12, %s756_s13  ;;  %p247_p6 = scmp.lt.s32.totalorder (!%p199_p3), %s760_s14, 1 }
   0xa   : > { %s947_s20 = smov (%p30_p4, %s945_s20), 0  ;;  %s949_s21 = smov (!%p30_p4, %s32_s21), %s772_s17 }
   0xb   : > { %p34_p5 = scmp.ge.s32.totalorder %s949_s21, 2  ;;  %202 = sbr.rel (%p199_p3) target bundleno = 233 (0xe9), region = 32 }
   0xc   : > { %s847_s23 = sadd.s32 (!%p199_p3), 4294967295, %s241_s22  ;;  %p262_p9 = scmp.lt.s32.totalorder (!%p199_p3), %s752_s12, 2 }
   0xd   : > { %s951_s21 = smov (%p34_p5, %s949_s21), 0  ;;  %p243_p7 = scmp.gt.s32.totalorder (!%p199_p3), %s847_s23, 0 }
   0xe   : > { %934 = sst [smem:[#allocation3_spill]] %s951_s21  ;;  %p597_p8 = scmp.lt.s32.totalorder (!%p199_p3), %s847_s23, 3 }
   0xf   : > { %p269_p11 = scmp.lt.s32.totalorder (!%p199_p3), %s756_s13, 3  ;;  %p610_p12 = scmp.ne.s32.totalorder (!%p199_p3), %s752_s12, 0 }
  0x10   : > { %s244_s24 = scalar_select %p243_p7, %s847_s23, 0 }
  0x11   : > { %s953_s14 = smov (!%p247_p6, %s760_s14), 1  ;;  %s959_s13 = smov (!%p269_p11, %s756_s13), 3 }
  0x12   : > { %s955_s24 = smov (!%p597_p8, %s244_s24), 3  ;;  %s603_s26 = sshll.u32 %s953_s14, 5 }
  0x13   : > { %s263_s25 = scalar_select %p262_p9, %s752_s12, 2 }
  0x14   : > { %p249_p10 = scmp.lt.s32.totalorder %s955_s24, 3  ;;  %s606_s10 = sshll.u32 %s959_s13, 3 }
  0x15   : > { %s663_s27 = smul.u32 20, %s263_s25  ;;  %s273_s11 = sadd.s32 %s606_s10, %s603_s26 }
  0x16   : > { %s957_s24 = smov (!%p249_p10, %s955_s24), 3  ;;  %s608_s14 = sshll.u32 %s273_s11, 2 }
  0x17   : > { %s857_s30 = scalar_lea.vmem %s931_s1, %s663_s27  ;;  %s602_s4 = sshll.u32 %s957_s24, 3 }
  0x18   : > { %s253_s5 = sadd.s32 %s603_s26, %s602_s4  ;;  %s869_s21 = scalar_lea.vmem %s933_s3, %s608_s14 }
  0x19   : > { %s604_s6 = sshll.u32 %s253_s5, 2  ;;  %282 = sbr.rel (%p610_p12) target bundleno = 39 (0x27), region = 36 }
  0x1a   : > { %s863_s9 = scalar_lea.vmem %s930_s0, %s604_s6 }
  0x1e   : > { %vm283_vm0 = vcmask 130048   ;;  %v778_v0 = vmov 0.0  }
  0x1f   : > { %284 = vst.msk [vmem:[#allocation2] sm:$0xff] %vm283_vm0, %v778_v0 }
  0x20   : > { %285 = vst.msk [vmem:[#allocation2 + $0x8] sm:$0xff] %vm283_vm0, %v778_v0 }
  0x21   : > { %286 = vst.msk [vmem:[#allocation2 + $0x10] sm:$0xff] %vm283_vm0, %v778_v0 }
  0x22   : > { %287 = vst.msk [vmem:[#allocation2 + $0x18] sm:$0xff] %vm283_vm0, %v778_v0 }
  0x23   : > { %288 = vst.msk [vmem:[#allocation2 + $0x20] sm:$0xff] %vm283_vm0, %v778_v0 }
  0x24   : > { %289 = vst.msk [vmem:[#allocation2 + $0x28] sm:$0xff] %vm283_vm0, %v778_v0 }
  0x25   : > { %290 = vst.msk [vmem:[#allocation2 + $0x30] sm:$0xff] %vm283_vm0, %v778_v0 }
  0x26   : > { %291 = vst.msk [vmem:[#allocation2 + $0x38] sm:$0xff] %vm283_vm0, %v778_v0 }
  0x27 PF: > { %p292_p13 = scmp.ge.s32.totalorder %s847_s23, 0  ;;  %p293_p0 = scmp.lt.s32.totalorder %s847_s23, 4 }
  0x29   : > { %p294_p1 = pnand %p293_p0, %p292_p13 }
  0x2b   : > { %297 = sbr.rel (%p294_p1) target bundleno = 210 (0xd2), region = 40 }
  0x30   : > { %v318_v1 = vld [vmem:[%s857_s30 + $0x10] sm:$0x3]  ;;  %vm367_vm1 = vcmask 1041408   ;;  %v653_v5 = vld [vmem:[%s857_s30 + $0x8] sm:$0xff]  ;;  %v652_v6 = vld [vmem:[%s857_s30] sm:$0xff]  ;;  %vm354_vm2 = vcmask 293888  }
  0x31   : > { %v348_v2 = vunpack.c.l.b16 %v318_v1  ;;  %v648_v7 = vld [vmem:[%s863_s9] sm:$0xff]  ;;  %v649_v8 = vld [vmem:[%s863_s9 + $0x8] sm:$0xff]  ;;  %v650_v9 = vld [vmem:[%s863_s9 + $0x10] sm:$0xff]  ;;  %vm408_vm3 = vcmask 130048  }
  0x32   : > { %v651_v10 = vld [vmem:[%s863_s9 + $0x18] sm:$0xff]  ;;  %v298_v11 = vld [vmem:[#allocation2] sm:$0xff]  ;;  %v300_v12 = vld [vmem:[#allocation2 + $0x10] sm:$0xff] }
  0x33   : > { %v351_v3 = vpack.c.b16 %v348_v2, %v348_v2  ;;  %v302_v17 = vld [vmem:[#allocation2 + $0x20] sm:$0xff]  ;;  %v304_v18 = vld [vmem:[#allocation2 + $0x30] sm:$0xff]  ;;  %v299_v19 = vld [vmem:[#allocation2 + $0x8] sm:$0xff] }
  0x34   : > { %v301_v20 = vld [vmem:[#allocation2 + $0x18] sm:$0xff]  ;;  %v303_v29 = vld [vmem:[#allocation2 + $0x28] sm:$0xff] }
  0x35   : > { %v369_v4 = vsel %vm367_vm1, %v351_v3, 0  ;;  %v305_v30 = vld [vmem:[#allocation2 + $0x38] sm:$0xff] }
  0x36   : > { %376 = vmatpush.bf16.msra.mxu0 %v369_v4  ;;  %654 = vmatpush.bf16.msra.mxu1 %v369_v4 }
  0x37   : > { %655 = vmatpush.bf16.msra.mxu2 %v369_v4  ;;  %656 = vmatpush.bf16.msra.mxu3 %v369_v4 }
  0x3a   : > { %377 = vmatpush.bf16.msra.mxu0 %v653_v5  ;;  %657 = vmatpush.bf16.msra.mxu1 %v653_v5 }
  0x3b   : > { %658 = vmatpush.bf16.msra.mxu2 %v653_v5  ;;  %659 = vmatpush.bf16.msra.mxu3 %v653_v5 }
  0x3e   : > { %378 = vmatpush.bf16.msra.mxu0 %v652_v6  ;;  %660 = vmatpush.bf16.msra.mxu1 %v652_v6 }
  0x3f   : > { %661 = vmatpush.bf16.msra.mxu2 %v652_v6  ;;  %662 = vmatpush.bf16.msra.mxu3 %v652_v6 }
  0x41   : > { %635 = vmatmul.msk.bf16.vlgmr.msra.gmra.mxu0 %vm354_vm2, %v648_v7  ;;  %636 = vmatmul.msk.bf16.vlgmr.msra.gmra.mxu1 %vm354_vm2, %v649_v8 }
  0x42   : > { %637 = vmatmul.msk.bf16.vlgmr.msra.gmra.mxu2 %vm354_vm2, %v650_v9  ;;  %638 = vmatmul.msk.bf16.vlgmr.msra.gmra.mxu3 %vm354_vm2, %v651_v10 }
  0xbe   : > { %v380_v13 = vpop.f32.mrf.mxu0  ;;  %v385_v14 = vpop.f32.mrf.mxu1 }
  0xbf   : > { %v400_v15 = vadd.f32 %v380_v13, %v298_v11  ;;  %v402_v16 = vadd.f32 %v385_v14, %v300_v12 }
  0xc1   : > { %409 = vst.msk [vmem:[#allocation2] sm:$0xff] %vm408_vm3, %v400_v15 }
  0xc2   : > { %411 = vst.msk [vmem:[#allocation2 + $0x10] sm:$0xff] %vm408_vm3, %v402_v16 }
  0xc5   : > { %v390_v21 = vpop.f32.mrf.mxu2  ;;  %v395_v22 = vpop.f32.mrf.mxu3 }
  0xc6   : > { %v404_v23 = vadd.f32 %v390_v21, %v302_v17  ;;  %v406_v24 = vadd.f32 %v395_v22, %v304_v18  ;;  %v382_v25 = vpop.f32.mrf.mxu0  ;;  %v387_v26 = vpop.f32.mrf.mxu1 }
  0xc7   : > { %v401_v27 = vadd.f32 %v382_v25, %v299_v19  ;;  %v403_v28 = vadd.f32 %v387_v26, %v301_v20 }
  0xc8   : > { %413 = vst.msk [vmem:[#allocation2 + $0x20] sm:$0xff] %vm408_vm3, %v404_v23 }
  0xc9   : > { %415 = vst.msk [vmem:[#allocation2 + $0x30] sm:$0xff] %vm408_vm3, %v406_v24 }
  0xca   : > { %410 = vst.msk [vmem:[#allocation2 + $0x8] sm:$0xff] %vm408_vm3, %v401_v27 }
  0xcb   : > { %412 = vst.msk [vmem:[#allocation2 + $0x18] sm:$0xff] %vm408_vm3, %v403_v28 }
  0xcd   : > { %v392_v31 = vpop.f32.mrf.mxu2  ;;  %v397_v32 = vpop.f32.mrf.mxu3 }
  0xce   : > { %v405_v33 = vadd.f32 %v392_v31, %v303_v29  ;;  %v407_v34 = vadd.f32 %v397_v32, %v305_v30 }
  0xd0   : > { %414 = vst.msk [vmem:[#allocation2 + $0x28] sm:$0xff] %vm408_vm3, %v405_v33 }
  0xd1   : > { %416 = vst.msk [vmem:[#allocation2 + $0x38] sm:$0xff] %vm408_vm3, %v407_v34 }
  0xd2 PF: > { %p639_p2 = scmp.ne.s32.totalorder %s752_s12, 2 }
  0xd4   : > { %420 = sbr.rel (%p639_p2) target bundleno = 233 (0xe9), region = 44 }
  0xd9   : > { %v421_v35 = vld [vmem:[#allocation2] sm:$0xff]  ;;  %v422_v37 = vld [vmem:[#allocation2 + $0x8] sm:$0xff]  ;;  %v423_v38 = vld [vmem:[#allocation2 + $0x10] sm:$0xff]  ;;  %vm457_vm4 = vcmask 125952  }
  0xda   : > { %v721_v36 = vld [vmem:[%s932_s2] ss:$0 sm:$0xff]  ;;  %v424_v39 = vld [vmem:[#allocation2 + $0x18] sm:$0xff]  ;;  %v426_v45 = vld [vmem:[#allocation2 + $0x28] sm:$0xff] }
  0xdb   : > { %v433_v40 = vadd.f32 %v721_v36, %v421_v35  ;;  %v434_v41 = vadd.f32 %v721_v36, %v422_v37  ;;  %v435_v42 = vadd.f32 %v721_v36, %v423_v38  ;;  %v436_v43 = vadd.f32 %v721_v36, %v424_v39  ;;  %v425_v44 = vld [vmem:[#allocation2 + $0x20] sm:$0xff]  ;;  %v427_v46 = vld [vmem:[#allocation2 + $0x30] sm:$0xff]  ;;  %v428_v50 = vld [vmem:[#allocation2 + $0x38] sm:$0xff] }
  0xdc   : > { %v437_v47 = vadd.f32 %v721_v36, %v425_v44  ;;  %v438_v48 = vadd.f32 %v721_v36, %v426_v45  ;;  %v439_v49 = vadd.f32 %v721_v36, %v427_v46  ;;  %v440_v57 = vadd.f32 %v721_v36, %v428_v50 }
  0xdd   : > { %v441_v51 = vmax.f32 %v433_v40, 0.0  ;;  %v442_v52 = vmax.f32 %v434_v41, 0.0  ;;  %v443_v53 = vmax.f32 %v435_v42, 0.0  ;;  %v444_v54 = vmax.f32 %v436_v43, 0.0 }
  0xde   : > { %v445_v55 = vmax.f32 %v437_v47, 0.0  ;;  %v446_v56 = vmax.f32 %v438_v48, 0.0  ;;  %v447_v61 = vmax.f32 %v439_v49, 0.0  ;;  %v448_v63 = vmax.f32 %v440_v57, 0.0 }
  0xdf   : > { %v449_v58 = vpack.c.bf16 %v441_v51, %v441_v51  ;;  %v450_v59 = vpack.c.bf16 %v442_v52, %v442_v52  ;;  %v451_v60 = vpack.c.bf16 %v443_v53, %v443_v53  ;;  %v452_v62 = vpack.c.bf16 %v444_v54, %v444_v54 }
  0xe0   : > { %v453_v0 = vpack.c.bf16 %v445_v55, %v445_v55  ;;  %v454_v1 = vpack.c.bf16 %v446_v56, %v446_v56  ;;  %v455_v2 = vpack.c.bf16 %v447_v61, %v447_v61  ;;  %v456_v3 = vpack.c.bf16 %v448_v63, %v448_v63 }
  0xe1   : > { %458 = vst.msk [vmem:[%s869_s21] sm:$0xf] %vm457_vm4, %v449_v58 }
  0xe2   : > { %459 = vst.msk [vmem:[%s869_s21 + $0x4] sm:$0xf] %vm457_vm4, %v450_v59 }
  0xe3   : > { %460 = vst.msk [vmem:[%s869_s21 + $0x8] sm:$0xf] %vm457_vm4, %v451_v60 }
  0xe4   : > { %461 = vst.msk [vmem:[%s869_s21 + $0xc] sm:$0xf] %vm457_vm4, %v452_v62 }
  0xe5   : > { %462 = vst.msk [vmem:[%s869_s21 + $0x10] sm:$0xf] %vm457_vm4, %v453_v0 }
  0xe6   : > { %463 = vst.msk [vmem:[%s869_s21 + $0x14] sm:$0xf] %vm457_vm4, %v454_v1 }
  0xe7   : > { %464 = vst.msk [vmem:[%s869_s21 + $0x18] sm:$0xf] %vm457_vm4, %v455_v2 }
  0xe8   : > { %465 = vst.msk [vmem:[%s869_s21 + $0x1c] sm:$0xf] %vm457_vm4, %v456_v3 }
  0xe9 PF: > { %s13_s18 = sadd.s32 1, %s776_s18   ;;  %s935_s24 = sld [smem:[#allocation3_spill]] }
  0xea   : > { %p10_p3 = scmp.ge.s32.totalorder %s13_s18, 26   ;;  %s936_s12 = smov %s764_s15 }
  0xeb   : > { %s937_s13 = smov %s768_s16  ;;  %s938_s14 = smov %s772_s17 }
  0xec   : > { %s939_s15 = smov %s943_s19  ;;  %s940_s16 = smov %s947_s20 }
  0xed   :  { %12 = sbr.rel (!%p10_p3) target bundleno = 4 (0x4), region = 77 }
  0xef   : > { %s941_s17 = smov %s935_s24 }

// kernel: basic_block_forward.7
= control target key start
LH: loop header
LB: loop body
LE: loop exit
PB: predicated region body
PF: predicated region fallthrough
CT: control target
= control target key end

     0   :  { %9 = vsyncpa [#allocation4], 0  ;;  %s1204_s0 = inlined_call_operand.vmem [shape: bf16[2,4,64,36], index: 0, kind: input, shape index: {}]   ;;  %s1205_s1 = inlined_call_operand.vmem [shape: bf16[3,36,16], index: 1, kind: input, shape index: {}]   ;;  %s1206_s2 = inlined_call_operand.vmem [shape: f32[1,16], index: 2, kind: input, shape index: {}]   ;;  %s1207_s3 = inlined_call_operand.vmem [shape: f32[2,4,64,16], index: 3, kind: input, shape index: {}]   ;;  %s1208_s4 = inlined_call_operand.hbm [shape: f32[2,4,64,16], index: 4, kind: output, shape index: {}]  }
   0x1   :  { %11 = vsyncpa [#allocation4 + $0x1], 0  ;;  %s988_s15 = smov 0   ;;  %s990_s16 = smov 0  }
   0x2   :  { %s992_s17 = smov 0   ;;  %s994_s18 = smov 0  }
   0x3   :  { %s996_s19 = smov 0   ;;  %s998_s20 = smov 0  }
   0x4   :  { %s1000_s21 = smov 0   ;;  %s1002_s22 = smov 0  }
   0x5   :  { %s1004_s23 = smov 0   ;;  %s1006_s24 = smov 0  }
   0x6 LB: > { %1218 = sst [smem:[#allocation6_spill]] %s922_s15  ;;  %s667_s25 = sadd.s32 4294967295, %s958_s24   ;;  %s958_s24 = sphi %s1006_s24, %s17_s24   ;;  %s954_s23 = sphi %s1004_s23, %s1240_s23   ;;  %s950_s22 = sphi %s1002_s22, %s1239_s22   ;;  %s946_s21 = sphi %s1000_s21, %s1243_s21   ;;  %s942_s20 = sphi %s998_s20, %s1237_s20   ;;  %s938_s19 = sphi %s996_s19, %s1236_s19   ;;  %s934_s18 = sphi %s994_s18, %s1235_s18   ;;  %s930_s17 = sphi %s992_s17, %s1234_s17   ;;  %s926_s16 = sphi %s990_s16, %s1242_s16   ;;  %s922_s15 = sphi %s988_s15, %s1241_s15  }
   0x7   : > { %1219 = sst [smem:[#allocation7_spill]] %s930_s17  ;;  %s668_s26 = sadd.s32 4294967294, %s958_s24  }
   0x8   : > { %1220 = sst [smem:[#allocation8_spill]] %s946_s21  ;;  %s29_s27 = sadd.s32 1, %s946_s21 }
   0x9   : > { %1221 = sst [smem:[#allocation9_spill]] %s950_s22  ;;  %p30_p0 = scmp.ge.s32.totalorder %s29_s27, 3 }
   0xa   : > { %1222 = sst [smem:[#allocation10_spill]] %s954_s23  ;;  %s32_s28 = sadd.s32 1, %s950_s22 }
   0xb   : > { %s36_s29 = sadd.s32 1, %s954_s23  ;;  %p170_p1 = scmp.ne.s32.totalorder %s930_s17, %s926_s16 }
   0xc   : > { %s1245_s27 = smov (%p30_p0, %s29_s27), 0  ;;  %s1247_s28 = smov (!%p30_p0, %s32_s28), %s950_s22 }
   0xd   : > { %1223 = sst [smem:[#allocation11_spill]] %s1245_s27  ;;  %p171_p2 = scmp.eq.s32.totalorder %s667_s25, 23 }
   0xe   : > { %p176_p3 = scmp.ne.s32.totalorder %s926_s16, %s922_s15  ;;  %p34_p4 = scmp.ge.s32.totalorder %s1247_s28, 4 }
   0xf   : > { %p177_p5 = scmp.eq.s32.totalorder %s668_s26, 23  ;;  %p1050_p6 = por %p171_p2, %p170_p1 }
  0x10   : > { %s1249_s28 = smov (%p34_p4, %s1247_s28), 0  ;;  %s1251_s29 = smov (!%p34_p4, %s36_s29), %s954_s23 }
  0x11   : > { %1225 = sst [smem:[#allocation12_spill]] %s1249_s28  ;;  %p1057_p7 = por %p177_p5, %p176_p3 }
  0x12   : > { %p683_p8 = scmp.ge.s32.totalorder %s958_s24, 1  ;;  %p38_p9 = scmp.ge.s32.totalorder %s1251_s29, 2 }
  0x13   : > { %s1226_s5 = scalar_select %p1057_p7, 1, 0 }
  0x14   : > { %p242_p10 = scmp.lt.s32.totalorder %s958_s24, 25  ;;  %s156_s6 = ssub.s32 %s950_s22, %s1249_s28 }
  0x15   : > { %1227 = sst [smem:[#allocation13_spill]] %s1226_s5  ;;  %s1253_s29 = smov (%p38_p9, %s1251_s29), 0 }
  0x16   : > { %1228 = sst [smem:[#allocation14_spill]] %s1253_s29  ;;  %p243_p11 = pnand %p683_p8, %p242_p10 }
  0x17   : > { %s155_s7 = ssub.s32 %s954_s23, %s1253_s29  ;;  %s160_s9 = sadd.s32 1, %s930_s17 }
  0x18   : > { %s157_s8 = sor.u32 %s156_s6, %s155_s7  ;;  %s1209_s11 = sand.u32 (!%p243_p11), 1, %s926_s16  }
  0x19   : > { %p158_p12 = scmp.eq.s32.totalorder %s157_s8, 0  ;;  %246 = sbr.rel (%p243_p11) target bundleno = 268 (0x10c), region = 36 }
  0x1a   : > { %s292_s12 = sadd.s32 (!%p243_p11), %s934_s18, %s938_s19  ;;  %s684_s13 = sshll.u32 (!%p243_p11), %s1209_s11, 6 }
  0x1b   : > { %s1071_s10 = scalar_select %p158_p12, %s930_s17, %s160_s9  }
  0x1c   : > { %s1078_s14 = sadd.s32 (!%p243_p11), 4294967295, %s292_s12  ;;  %p298_p1 = scmp.lt.s32.totalorder (!%p243_p11), %s942_s20, 1 }
  0x1d   : > { %1229 = sst [smem:[#allocation15_spill]] %s1071_s10  ;;  %p294_p13 = scmp.gt.s32.totalorder (!%p243_p11), %s1078_s14, 0 }
  0x1e   : > { %p686_p0 = scmp.lt.s32.totalorder %s1078_s14, 3  ;;  %p313_p2 = scmp.lt.s32.totalorder %s934_s18, 2 }
  0x1f   : > { %s295_s25 = scalar_select %p294_p13, %s1078_s14, 0 }
  0x20   : > { %s299_s26 = scalar_select %p298_p1, %s942_s20, 1 }
  0x21   : > { %s1255_s25 = smov (!%p686_p0, %s295_s25), 3  ;;  %p320_p4 = scmp.lt.s32.totalorder %s938_s19, 3 }
  0x22   : > { %p300_p3 = scmp.lt.s32.totalorder %s1255_s25, 3  ;;  %s692_s6 = sshll.u32 %s299_s26, 5 }
  0x23   : > { %s314_s7 = scalar_select %p313_p2, %s934_s18, 2 }
  0x24   : > { %s1257_s25 = smov (!%p300_p3, %s1255_s25), 3  ;;  %p699_p5 = scmp.ne.s32.totalorder %s934_s18, 0 }
  0x25   : > { %s756_s8 = smul.u32 20, %s314_s7  ;;  %s691_s9 = sshll.u32 %s1257_s25, 3 }
  0x26   : > { %s304_s12 = sadd.s32 %s692_s6, %s691_s9  ;;  %s1104_s9 = scalar_lea.vmem [#allocation3], %s684_s13 }
  0x27   : > { %s1091_s28 = scalar_lea.vmem %s1205_s1, %s756_s8  ;;  %s693_s27 = sshll.u32 %s304_s12, 2 }
  0x28   : > { %s1096_s21 = scalar_lea.vmem %s1204_s0, %s693_s27 }
  0x29   : > { %s321_s10 = scalar_select %p320_p4, %s938_s19, 3 }
  0x2a   : > { %333 = sbr.rel (%p699_p5) target bundleno = 56 (0x38), region = 40 }
  0x2b   : > { %s695_s17 = sshll.u32 %s321_s10, 3 }
  0x2c   : > { %s324_s26 = sadd.s32 %s695_s17, %s692_s6 }
  0x2d   : > { %s697_s5 = sshll.u32 %s324_s26, 3 }
  0x2e   : > { %s1102_s25 = scalar_lea.vmem %s1207_s3, %s697_s5 }
  0x2f   : > { %vm334_vm0 = vcmask 130048   ;;  %v960_v0 = vmov 0.0  }
  0x30   : > { %335 = vst.msk [vmem:[#allocation2] sm:$0xff] %vm334_vm0, %v960_v0 }
  0x31   : > { %336 = vst.msk [vmem:[#allocation2 + $0x8] sm:$0xff] %vm334_vm0, %v960_v0 }
  0x32   : > { %337 = vst.msk [vmem:[#allocation2 + $0x10] sm:$0xff] %vm334_vm0, %v960_v0 }
  0x33   : > { %338 = vst.msk [vmem:[#allocation2 + $0x18] sm:$0xff] %vm334_vm0, %v960_v0 }
  0x34   : > { %339 = vst.msk [vmem:[#allocation2 + $0x20] sm:$0xff] %vm334_vm0, %v960_v0 }
  0x35   : > { %340 = vst.msk [vmem:[#allocation2 + $0x28] sm:$0xff] %vm334_vm0, %v960_v0 }
  0x36   : > { %341 = vst.msk [vmem:[#allocation2 + $0x30] sm:$0xff] %vm334_vm0, %v960_v0 }
  0x37   : > { %342 = vst.msk [vmem:[#allocation2 + $0x38] sm:$0xff] %vm334_vm0, %v960_v0 }
  0x38 PF: > { %p343_p8 = scmp.ge.s32.totalorder %s1078_s14, 0  ;;  %p344_p9 = scmp.lt.s32.totalorder %s1078_s14, 4 }
  0x3a   : > { %p345_p10 = pnand %p344_p9, %p343_p8 }
  0x3c   : > { %348 = sbr.rel (%p345_p10) target bundleno = 227 (0xe3), region = 44 }
  0x41   : > { %v369_v1 = vld [vmem:[%s1091_s28 + $0x10] sm:$0x3]  ;;  %vm418_vm1 = vcmask 1041408   ;;  %v746_v5 = vld [vmem:[%s1091_s28 + $0x8] sm:$0xff]  ;;  %v745_v6 = vld [vmem:[%s1091_s28] sm:$0xff]  ;;  %vm405_vm2 = vcmask 293888  }
  0x42   : > { %v399_v2 = vunpack.c.l.b16 %v369_v1  ;;  %v741_v7 = vld [vmem:[%s1096_s21] sm:$0xff]  ;;  %v742_v8 = vld [vmem:[%s1096_s21 + $0x8] sm:$0xff]  ;;  %v743_v9 = vld [vmem:[%s1096_s21 + $0x10] sm:$0xff]  ;;  %vm459_vm3 = vcmask 130048  }
  0x43   : > { %v744_v10 = vld [vmem:[%s1096_s21 + $0x18] sm:$0xff]  ;;  %v349_v11 = vld [vmem:[#allocation2] sm:$0xff]  ;;  %v351_v12 = vld [vmem:[#allocation2 + $0x10] sm:$0xff] }
  0x44   : > { %v402_v3 = vpack.c.b16 %v399_v2, %v399_v2  ;;  %v353_v17 = vld [vmem:[#allocation2 + $0x20] sm:$0xff]  ;;  %v355_v18 = vld [vmem:[#allocation2 + $0x30] sm:$0xff]  ;;  %v350_v19 = vld [vmem:[#allocation2 + $0x8] sm:$0xff] }
  0x45   : > { %v352_v20 = vld [vmem:[#allocation2 + $0x18] sm:$0xff]  ;;  %v354_v29 = vld [vmem:[#allocation2 + $0x28] sm:$0xff] }
  0x46   : > { %v420_v4 = vsel %vm418_vm1, %v402_v3, 0  ;;  %v356_v30 = vld [vmem:[#allocation2 + $0x38] sm:$0xff] }
  0x47   : > { %427 = vmatpush.bf16.msra.mxu0 %v420_v4  ;;  %747 = vmatpush.bf16.msra.mxu1 %v420_v4 }
  0x48   : > { %748 = vmatpush.bf16.msra.mxu2 %v420_v4  ;;  %749 = vmatpush.bf16.msra.mxu3 %v420_v4 }
  0x4b   : > { %428 = vmatpush.bf16.msra.mxu0 %v746_v5  ;;  %750 = vmatpush.bf16.msra.mxu1 %v746_v5 }
  0x4c   : > { %751 = vmatpush.bf16.msra.mxu2 %v746_v5  ;;  %752 = vmatpush.bf16.msra.mxu3 %v746_v5 }
  0x4f   : > { %429 = vmatpush.bf16.msra.mxu0 %v745_v6  ;;  %753 = vmatpush.bf16.msra.mxu1 %v745_v6 }
  0x50   : > { %754 = vmatpush.bf16.msra.mxu2 %v745_v6  ;;  %755 = vmatpush.bf16.msra.mxu3 %v745_v6 }
  0x52   : > { %724 = vmatmul.msk.bf16.vlgmr.msra.gmra.mxu0 %vm405_vm2, %v741_v7  ;;  %725 = vmatmul.msk.bf16.vlgmr.msra.gmra.mxu1 %vm405_vm2, %v742_v8 }
  0x53   : > { %726 = vmatmul.msk.bf16.vlgmr.msra.gmra.mxu2 %vm405_vm2, %v743_v9  ;;  %727 = vmatmul.msk.bf16.vlgmr.msra.gmra.mxu3 %vm405_vm2, %v744_v10 }
  0xcf   : > { %v431_v13 = vpop.f32.mrf.mxu0  ;;  %v436_v14 = vpop.f32.mrf.mxu1 }
  0xd0   : > { %v451_v15 = vadd.f32 %v431_v13, %v349_v11  ;;  %v453_v16 = vadd.f32 %v436_v14, %v351_v12 }
  0xd2   : > { %460 = vst.msk [vmem:[#allocation2] sm:$0xff] %vm459_vm3, %v451_v15 }
  0xd3   : > { %462 = vst.msk [vmem:[#allocation2 + $0x10] sm:$0xff] %vm459_vm3, %v453_v16 }
  0xd6   : > { %v441_v21 = vpop.f32.mrf.mxu2  ;;  %v446_v22 = vpop.f32.mrf.mxu3 }
  0xd7   : > { %v455_v23 = vadd.f32 %v441_v21, %v353_v17  ;;  %v457_v24 = vadd.f32 %v446_v22, %v355_v18  ;;  %v433_v25 = vpop.f32.mrf.mxu0  ;;  %v438_v26 = vpop.f32.mrf.mxu1 }
  0xd8   : > { %v452_v27 = vadd.f32 %v433_v25, %v350_v19  ;;  %v454_v28 = vadd.f32 %v438_v26, %v352_v20 }
  0xd9   : > { %464 = vst.msk [vmem:[#allocation2 + $0x20] sm:$0xff] %vm459_vm3, %v455_v23 }
  0xda   : > { %466 = vst.msk [vmem:[#allocation2 + $0x30] sm:$0xff] %vm459_vm3, %v457_v24 }
  0xdb   : > { %461 = vst.msk [vmem:[#allocation2 + $0x8] sm:$0xff] %vm459_vm3, %v452_v27 }
  0xdc   : > { %463 = vst.msk [vmem:[#allocation2 + $0x18] sm:$0xff] %vm459_vm3, %v454_v28 }
  0xde   : > { %v443_v31 = vpop.f32.mrf.mxu2  ;;  %v448_v32 = vpop.f32.mrf.mxu3 }
  0xdf   : > { %v456_v33 = vadd.f32 %v443_v31, %v354_v29  ;;  %v458_v34 = vadd.f32 %v448_v32, %v356_v30 }
  0xe1   : > { %465 = vst.msk [vmem:[#allocation2 + $0x28] sm:$0xff] %vm459_vm3, %v456_v33 }
  0xe2   : > { %467 = vst.msk [vmem:[#allocation2 + $0x38] sm:$0xff] %vm459_vm3, %v458_v34 }
  0xe3 PF: > { %p728_p11 = scmp.ne.s32.totalorder %s934_s18, 2 }
  0xe5   : > { %471 = sbr.rel (%p728_p11) target bundleno = 250 (0xfa), region = 48 }
  0xea   : > { %v472_v35 = vld [vmem:[#allocation2] sm:$0xff]  ;;  %v473_v38 = vld [vmem:[#allocation2 + $0x8] sm:$0xff]  ;;  %v474_v42 = vld [vmem:[#allocation2 + $0x10] sm:$0xff]  ;;  %vm516_vm4 = vcmask 130048  }
  0xeb   : > { %v847_v36 = vld [vmem:[%s1206_s2] ss:$0 sm:$0xff]  ;;  %v493_v39 = vld [vmem:[%s1102_s25 + $0x8] sm:$0xff]  ;;  %v494_v43 = vld [vmem:[%s1102_s25 + $0x10] sm:$0xff] }
  0xec   : > { %v492_v37 = vld [vmem:[%s1102_s25] sm:$0xff]  ;;  %v484_v40 = vadd.f32 %v847_v36, %v472_v35  ;;  %v485_v41 = vadd.f32 %v847_v36, %v473_v38  ;;  %v475_v44 = vld [vmem:[#allocation2 + $0x18] sm:$0xff]  ;;  %v486_v45 = vadd.f32 %v847_v36, %v474_v42  ;;  %v477_v53 = vld [vmem:[#allocation2 + $0x28] sm:$0xff] }
  0xed   : > { %v487_v46 = vadd.f32 %v847_v36, %v475_v44  ;;  %v495_v47 = vld [vmem:[%s1102_s25 + $0x18] sm:$0xff]  ;;  %v476_v48 = vld [vmem:[#allocation2 + $0x20] sm:$0xff]  ;;  %v497_v54 = vld [vmem:[%s1102_s25 + $0x28] sm:$0xff]  ;;  %v489_v58 = vadd.f32 %v847_v36, %v477_v53 }
  0xee   : > { %v496_v49 = vld [vmem:[%s1102_s25 + $0x20] sm:$0xff]  ;;  %v500_v50 = vadd.f32 %v492_v37, %v484_v40  ;;  %v501_v51 = vadd.f32 %v493_v39, %v485_v41  ;;  %v488_v52 = vadd.f32 %v847_v36, %v476_v48  ;;  %v478_v55 = vld [vmem:[#allocation2 + $0x30] sm:$0xff]  ;;  %v502_v56 = vadd.f32 %v494_v43, %v486_v45  ;;  %v479_v61 = vld [vmem:[#allocation2 + $0x38] sm:$0xff] }
  0xef   : > { %v503_v57 = vadd.f32 %v495_v47, %v487_v46  ;;  %v490_v59 = vadd.f32 %v847_v36, %v478_v55  ;;  %v498_v60 = vld [vmem:[%s1102_s25 + $0x30] sm:$0xff]  ;;  %v499_v62 = vld [vmem:[%s1102_s25 + $0x38] sm:$0xff]  ;;  %v491_v2 = vadd.f32 %v847_v36, %v479_v61  ;;  %v505_v5 = vadd.f32 %v497_v54, %v489_v58 }
  0xf0   : > { %v508_v63 = vmax.f32 %v500_v50, 0.0  ;;  %v509_v0 = vmax.f32 %v501_v51, 0.0  ;;  %v504_v1 = vadd.f32 %v496_v49, %v488_v52  ;;  %v510_v3 = vmax.f32 %v502_v56, 0.0 }
  0xf1   : > { %v511_v4 = vmax.f32 %v503_v57, 0.0  ;;  %v506_v6 = vadd.f32 %v498_v60, %v490_v59  ;;  %v507_v8 = vadd.f32 %v499_v62, %v491_v2  ;;  %v513_v9 = vmax.f32 %v505_v5, 0.0 }
  0xf2   : > { %517 = vst.msk [vmem:[%s1104_s9] sm:$0xff] %vm516_vm4, %v508_v63  ;;  %v512_v7 = vmax.f32 %v504_v1, 0.0 }
  0xf3   : > { %518 = vst.msk [vmem:[%s1104_s9 + $0x8] sm:$0xff] %vm516_vm4, %v509_v0  ;;  %v514_v10 = vmax.f32 %v506_v6, 0.0  ;;  %v515_v11 = vmax.f32 %v507_v8, 0.0 }
  0xf4   : > { %519 = vst.msk [vmem:[%s1104_s9 + $0x10] sm:$0xff] %vm516_vm4, %v510_v3 }
  0xf5   : > { %520 = vst.msk [vmem:[%s1104_s9 + $0x18] sm:$0xff] %vm516_vm4, %v511_v4 }
  0xf6   : > { %521 = vst.msk [vmem:[%s1104_s9 + $0x20] sm:$0xff] %vm516_vm4, %v512_v7 }
  0xf7   : > { %522 = vst.msk [vmem:[%s1104_s9 + $0x28] sm:$0xff] %vm516_vm4, %v513_v9 }
  0xf8   : > { %523 = vst.msk [vmem:[%s1104_s9 + $0x30] sm:$0xff] %vm516_vm4, %v514_v10 }
  0xf9   : > { %524 = vst.msk [vmem:[%s1104_s9 + $0x38] sm:$0xff] %vm516_vm4, %v515_v11 }
  0xfa PF: > { %s730_s18 = sshll.u32 %s938_s19, 3  ;;  %s731_s21 = sshll.u32 %s942_s20, 5 }
  0xfb   : > { %s540_s22 = sshll.u32 %s1104_s9, 4  ;;  %s537_s23 = sadd.s32 %s731_s21, %s730_s18  ;;  %s541_s22 = int_to_ptr.vmem [resolvable:$true] %s540_s22 }
  0xfc   : > { %s732_s27 = sshll.u32 %s537_s23, 3  ;;  %s1230_s11 = sand.u32 1, %s926_s16  }
  0xfd   : > { %s539_s5 = scalar_lea.hbm %s1208_s4, %s732_s27  ;;  %s526_s13 = scalar_lea.sflag [#allocation4], %s1230_s11 }
  0xfe   : > { %s542_s10 = sshll.u32 %s539_s5, 4  ;;  %s868_s8 = scalar_lea.hbm %s1208_s4, 512  ;;  %s543_s10 = int_to_ptr.hbm [resolvable:$true] %s542_s10 }
  0xff   : > { %s862_s14 = sshra.s32 %s543_s10, 4  ;;  %s863_s14 = int_to_ptr.hbm [resolvable:$true] %s862_s14 }
 0x100   : > { %s864_s6 = scalar_lea.hbm %s863_s14, 64  ;;  %p869_p1 = scmp.lt.s32.totalorder %s863_s14, %s1208_s4 }
 0x101   : > { %p865_p12 = scmp.ne.s32.totalorder %s863_s14, %s864_s6  ;;  %p870_p2 = scmp.lt.s32.totalorder %s868_s8, %s864_s6 }
 0x103   : > { %p866_p13 = pnand %p865_p12, %p1050_p6  ;;  %p871_p3 = por %p870_p2, %p869_p1 }
 0x105   : > { %p867_p0 = pneg %p866_p13 }
 0x107   : > { %p872_p4 = pnand %p871_p3, %p867_p0 }
 0x109   : > { %875 = shalt.err (!%p872_p4)
}
 0x10a   : > { %s961_s7 = smov 128   ;;  %s962_s25 = smov 8  }
 0x10b   : > { %757 = dma.vmem_to_hbm [thread:$0]  (%p1050_p6), %s541_s22, 1024, %s543_s10, %s526_s13, %s961_s7, %s961_s7, %s962_s25  }
 0x10c PF: > { %s1231_s9 = sld [smem:[#allocation6_spill]]  ;;  %p763_p5 = scmp.ge.s32.totalorder %s958_s24, 2 }
 0x10e   : > { %p760_p8 = pnand %p763_p5, %p1057_p7 }
 0x110   : > { %p761_p9 = pneg %p760_p8 }
 0x112   : > { %s557_s17 = sand.u32 1, %s1231_s9  }
 0x113   : > { %s558_s18 = scalar_lea.sflag [#allocation4], %s557_s17 }
 0x114   : > { %917 = dma.done.wait (%p761_p9), %s558_s18, 1024  }
 0x115   : > { %919 = vsyncadd (%p761_p9), %s558_s18, 4294966272  ;;  %s17_s24 = sadd.s32 1, %s958_s24   ;;  %s1233_s21 = sld [smem:[#allocation7_spill]] }
 0x116   : > { %p14_p10 = scmp.ge.s32.totalorder %s17_s24, 26   ;;  %s1234_s17 = sld [smem:[#allocation15_spill]] }
 0x117   : > { %s1235_s18 = sld [smem:[#allocation8_spill]]  ;;  %s1241_s15 = smov %s926_s16 }
 0x118   : > { %s1236_s19 = sld [smem:[#allocation9_spill]] }
 0x119   : > { %s1237_s20 = sld [smem:[#allocation10_spill]] }
 0x11a   : > { %s1238_s30 = sld [smem:[#allocation11_spill]] }
 0x11b   : > { %s1239_s22 = sld [smem:[#allocation12_spill]]  ;;  %s1242_s16 = smov %s1233_s21 }
 0x11c   : > { %s1240_s23 = sld [smem:[#allocation14_spill]]  ;;  %16 = sbr.rel (!%p14_p10) target bundleno = 6 (0x6), region = 89 }
 0x120   : > { %s1243_s21 = smov %s1238_s30 }
 0x121   :  { %564 = vsyncpa [#allocation4], 1 }
 0x122   :  { %566 = vsyncpa [#allocation4 + $0x1], 1 }

</bundles_post_ra>
